<compile_context>
chip_gen: v6e
topology: v6e:2x2x1
jax: 0.10.0
libtpu: 0.0.40
codegen_flags: <defaults>
</compile_context>

<pallas_src>
import functools
import math

import jax
import jax.numpy as jnp
from jax.experimental import pallas as pl
from jax.experimental.pallas import tpu as pltpu


def _softplus(z):
    # matches torch.nn.functional.softplus (beta=1, threshold=20), no overflow
    return jnp.where(z > 20.0, z, jnp.log1p(jnp.exp(jnp.minimum(z, 20.0))))


def _round_up(n, m):
    return ((n + m - 1) // m) * m


def _ssm_scan_kernel(dlow_ref, bct_ref, xd_ref, w_dt_ref, b_dt_ref, a_ref,
                     d_ref, out_ref, dlt_s, h_s, *,
                     d_state, time_tile, unroll, group_rows):
    """Grid = (batch, channel-tile, time-chunk).  One time chunk per call.

    refs:
      dlow_ref  (1, TL, R)     delta_low = (x @ W_dbc^T)[..., :R]   (hoisted to XLA)
      bct_ref   (1, G*SG, U)   group-interleaved [B^T | C^T]; for scan group g
                               rows [g*SG, g*SG+2S) hold a (2S, U) block whose
                               column k is timestep g*U+k
      xd_ref    (1, TL, TD)    this call's channel tile of x
      w_dt_ref  (R, TD)        dt_proj weight (transposed, channel tile)
      b_dt_ref  (1, TD)        dt_proj bias
      a_ref     (S, TD)        A^T = -(exp(A_log))^T
      d_ref     (1, TD)        D
      out_ref   (1, TL, TD)
    scratch:
      dlt_s (TL, TD)   delta for this chunk
      h_s   (S, TD)    hidden state carried across time chunks
    """
    S, TL, U, SG = d_state, time_tile, unroll, group_rows
    f32 = jnp.float32

    # new (batch, channel-tile) sequence starts -> reset the hidden-state carry
    @pl.when(pl.program_id(2) == 0)
    def _init():
        h_s[...] = jnp.zeros_like(h_s)

    # ---- chunk prologue: delta for the whole chunk (one MXU-efficient matmul)
    delta = _softplus(
        jnp.dot(dlow_ref[0], w_dt_ref[...], preferred_element_type=f32)
        + b_dt_ref[...])                       # (TL, TD) f32
    dlt_s[...] = delta                         # single contiguous (TL, TD) store

    a_val = a_ref[...]                         # (S, TD), hoisted out of the loop
    d_val = d_ref[...]                         # (1, TD)

    # ---- sequential selective scan, `U` timesteps per fori_loop iteration ----
    def group(i, h):                           # h: (S, TD) f32
        base = pl.multiple_of(i * U, U)        # first timestep of this group
        grow = pl.multiple_of(i * SG, SG)      # its row block inside bct
        d_grp = dlt_s[pl.ds(base, U), :]       # (U, TD)  delta
        x_grp = xd_ref[0, pl.ds(base, U), :]   # (U, TD)  x
        bct_g = bct_ref[0, pl.ds(grow, SG), :]  # (SG, U): [:S]=B^T, [S:2S]=C^T
        u_grp = d_grp * x_grp                  # (U, TD)  delta * x

        ys = []
        for k in range(U):
            # exp(delta*A) has no h dependence -> schedulable ahead of the chain
            da_k = jnp.exp(d_grp[k:k + 1, :] * a_val)             # (S, TD)
            # BX formed on the fly: (S,1) x (1,TD) broadcast multiply, no staging
            bx_k = bct_g[:S, k:k + 1] * u_grp[k:k + 1, :]         # (S, TD)
            h = da_k * h + bx_k
            # y_t = C_t . h_t : VPU multiply + sublane reduce (no MXU in the scan)
            ys.append(jnp.sum(bct_g[S:2 * S, k:k + 1] * h,
                              axis=0, keepdims=True))             # (1, TD)

        y_grp = jnp.concatenate(ys, axis=0)                       # (U, TD)
        # one aligned (U, TD) store per group, D * x skip fused in
        out_ref[0, pl.ds(base, U), :] = y_grp + d_val * x_grp
        return h

    h_fin = jax.lax.fori_loop(0, TL // U, group, h_s[...])
    h_s[...] = h_fin                           # carry to the next time chunk


def ssm_forward(x, w_dbc, w_dt, b_dt, a_log, d_vec, dt_rank, d_state, *,
                time_tile=256, unroll=8, d_tile=None,
                matmul_dtype=jnp.float32,
                vmem_limit_bytes=32 * 1024 * 1024):
    """SSM forward.  x: (B, L, dim_inner) f32  ->  (B, L, dim_inner) f32.

    matmul_dtype: set to jnp.bfloat16 on v6e/v7x for bf16-native MXU on the
    projections (recurrence stays f32); expect ~1e-2 rel. tolerance then.
    """
    B, L, DI = x.shape
    R, S = dt_rank, d_state
    R2S = R + 2 * S
    assert w_dbc.shape == (R2S, DI), w_dbc.shape
    assert w_dt.shape == (DI, R), w_dt.shape
    assert a_log.shape == (DI, S), a_log.shape

    # ---- channel (lane) tile: full dim, or a multiple of 128 ----------------
    if d_tile is None:
        d_tile = DI
        min_tiles = 2 if B == 1 else 1   # keep both v7x TensorCores busy at B==1
        for cand in (512, 256, 128):
            if cand < DI and DI % cand == 0 and DI // cand >= min_tiles:
                d_tile = cand
                break
    assert DI % d_tile == 0 and (d_tile == DI or d_tile % 128 == 0)
    nd = DI // d_tile

    # ---- time tile / unroll --------------------------------------------------
    unroll = max(1, min(unroll, 8))
    tl = min(max(time_tile, 8), _round_up(L, 8))
    tl = _round_up(tl, 8)
    unroll = math.gcd(unroll, tl)
    U = unroll
    l_pad = _round_up(L, tl)
    nl = l_pad // tl

    x_p = x if l_pad == L else jnp.pad(x, ((0, 0), (0, l_pad - L), (0, 0)))

    # ---- hoisted fused input projection (done once, in XLA) -----------------
    # dbc is channel-tile independent and only R+2S columns wide, so computing
    # it nd times inside the kernel (old version) was pure redundancy.
    dbc = jnp.dot(x_p.astype(matmul_dtype),
                  jnp.transpose(w_dbc).astype(matmul_dtype),
                  preferred_element_type=jnp.float32)        # (B, l_pad, R+2S)
    dlow = dbc[..., :R].astype(matmul_dtype)                 # (B, l_pad, R)

    # ---- B/C pre-transposed into a group-interleaved sublane layout ---------
    # For scan group g (timesteps g*U .. g*U+U-1) rows [g*SG, g*SG+2S) hold the
    # (2S, U) block [B^T | C^T].  The kernel then never transposes inside the
    # serial loop, never stages BX, and never does dynamic lane indexing.
    sg = _round_up(2 * S, 8)
    n_groups = l_pad // U
    bct = jnp.transpose(dbc[..., R:].reshape(B, n_groups, U, 2 * S),
                        (0, 1, 3, 2))                        # (B, G, 2S, U)
    if sg > 2 * S:
        bct = jnp.pad(bct, ((0, 0), (0, 0), (0, sg - 2 * S), (0, 0)))
    bct = bct.reshape(B, n_groups * sg, U)

    # ---- weights / params, pre-transposed so in-kernel ops are plain x @ W --
    a_t = jnp.transpose(-jnp.exp(a_log))                     # (S, DI)
    w_dt_t = jnp.transpose(w_dt).astype(matmul_dtype)        # (R, DI)
    b_dt_2d = b_dt.reshape(1, DI).astype(jnp.float32)
    d_2d = d_vec.reshape(1, DI).astype(jnp.float32)

    grp_rows_per_chunk = (tl // U) * sg

    grid_spec = pltpu.PrefetchScalarGridSpec(
        num_scalar_prefetch=0,
        grid=(B, nd, nl),
        in_specs=[
            pl.BlockSpec((1, tl, R), lambda b, d, l: (b, l, 0)),            # delta_low
            pl.BlockSpec((1, grp_rows_per_chunk, U),
                         lambda b, d, l: (b, l, 0)),                        # [B^T|C^T]
            pl.BlockSpec((1, tl, d_tile), lambda b, d, l: (b, l, d)),       # x tile
            pl.BlockSpec((R, d_tile), lambda b, d, l: (0, d)),              # W_dt^T
            pl.BlockSpec((1, d_tile), lambda b, d, l: (0, d)),              # b_dt
            pl.BlockSpec((S, d_tile), lambda b, d, l: (0, d)),              # A^T
            pl.BlockSpec((1, d_tile), lambda b, d, l: (0, d)),              # D
        ],
        out_specs=pl.BlockSpec((1, tl, d_tile), lambda b, d, l: (b, l, d)),
        scratch_shapes=[
            pltpu.VMEM((tl, d_tile), jnp.float32),    # delta (chunk)
            pltpu.VMEM((S, d_tile), jnp.float32),     # h carry across chunks
        ],
    )

    kernel = functools.partial(
        _ssm_scan_kernel, d_state=S, time_tile=tl, unroll=U, group_rows=sg)

    out = pl.pallas_call(
        kernel,
        out_shape=jax.ShapeDtypeStruct((B, l_pad, DI), jnp.float32),
        grid_spec=grid_spec,
        compiler_params=pltpu.CompilerParams(
            dimension_semantics=("parallel", "parallel", "arbitrary"),
            vmem_limit_bytes=vmem_limit_bytes),
    )(dlow, bct, x_p, w_dt_t, b_dt_2d, a_t, d_2d)

    return out if l_pad == L else out[:, :L, :]


def ssm_reference(x, w_dbc, w_dt, b_dt, a_log, d_vec, dt_rank, d_state):
    """Pure-JAX mirror of the PyTorch SSM forward (correctness check)."""
    A = -jnp.exp(a_log)                                            # (DI, S)
    dbc = x @ w_dbc.T
    delta_low, b_mat, c_mat = jnp.split(
        dbc, [dt_rank, dt_rank + d_state], axis=-1)
    delta = _softplus(delta_low @ w_dt.T + b_dt)                   # (B, L, DI)

    deltaA = jnp.exp(delta[..., None] * A)                         # (B, L, DI, S)
    bx = delta[..., None] * b_mat[:, :, None, :] * x[..., None]    # (B, L, DI, S)

    di, s = a_log.shape

    def step(h, inp):
        da_t, bx_t = inp
        h = da_t * h + bx_t
        return h, h

    def per_batch(da_b, bx_b):
        _, hs = jax.lax.scan(step, jnp.zeros((di, s), jnp.float32), (da_b, bx_b))
        return hs                                                  # (L, DI, S)

    hs = jax.vmap(per_batch)(deltaA, bx)                           # (B, L, DI, S)
    y = jnp.einsum('blds,bls->bld', hs, c_mat)
    return y + d_vec * x


if __name__ == "__main__":
    key = jax.random.PRNGKey(0)

    def make_params(k, di, r, s):
        k1, k2, k3 = jax.random.split(k, 3)
        w_dbc = jax.random.normal(k1, (r + 2 * s, di), jnp.float32) / jnp.sqrt(di)
        w_dt = jax.random.normal(k2, (di, r), jnp.float32) / jnp.sqrt(r)
        b_dt = 0.1 * jax.random.normal(k3, (di,), jnp.float32)
        a_log = jnp.log(jnp.tile(jnp.arange(1, s + 1, dtype=jnp.float32), (di, 1)))
        d_vec = jnp.ones((di,), jnp.float32)
        return w_dbc, w_dt, b_dt, a_log, d_vec

    configs = [
        # (B, L, dim_inner, dt_rank, d_state, time_tile)
        (2, 16, 32, 32, 32, 8),    # module-style: dt_rank=d_state=dim; 2 time chunks
        (2, 12, 32, 4, 8, 8),      # small ranks; exercises time padding (12 -> 16)
        (1, 40, 256, 16, 16, 16),  # B=1 forces nd=2 (channel split), 3 chunks + pad
    ]
    for i, (bsz, seq, di, r, s, tt) in enumerate(configs):
        kx, kp, key = jax.random.split(key, 3)
        x = jax.random.normal(kx, (bsz, seq, di), dtype=jnp.float32)
        params = make_params(kp, di, r, s)

        run = jax.jit(functools.partial(ssm_forward, dt_rank=r, d_state=s,
                                        time_tile=tt))
        out = jax.block_until_ready(run(x, *params))
        ref = jax.block_until_ready(ssm_reference(x, *params, dt_rank=r,
                                                  d_state=s))

        assert out.shape == (bsz, seq, di)
        err = float(jnp.max(jnp.abs(out - ref)))
        assert jnp.allclose(out, ref, rtol=1e-3, atol=1e-3), (
            f"config {i}: max abs err {err}")

    print("KERNEL_OK")
</pallas_src>

<mosaic_0001>
module attributes {stable_mosaic.version = 11 : i64} {
  func.func @_ssm_scan_kernel(%arg0: i32, %arg1: i32, %arg2: i32, %arg3: memref<1x8x32xf32, #tpu.memory_space<vmem>>, %arg4: memref<1x64x8xf32, #tpu.memory_space<vmem>>, %arg5: memref<1x8x32xf32, #tpu.memory_space<vmem>>, %arg6: memref<32x32xf32, #tpu.memory_space<vmem>>, %arg7: memref<1x32xf32, #tpu.memory_space<vmem>>, %arg8: memref<32x32xf32, #tpu.memory_space<vmem>>, %arg9: memref<1x32xf32, #tpu.memory_space<vmem>>, %arg10: memref<1x8x32xf32, #tpu.memory_space<vmem>>, %arg11: memref<8x32xf32, #tpu.memory_space<vmem>>, %arg12: memref<32x32xf32, #tpu.memory_space<vmem>>) attributes {dimension_semantics = [#tpu.dimension_semantics<parallel>, #tpu.dimension_semantics<parallel>, #tpu.dimension_semantics<arbitrary>], iteration_bounds = array<i64: 2, 1, 2>, scalar_prefetch = 0 : i64, scratch_operands = 2 : i64, tpu.core_type = #tpu.core_type<tc>, window_params = [{transform_indices = @transform_0, window_bounds = array<i64: 1, 8, 32>}, {transform_indices = @transform_1, window_bounds = array<i64: 1, 64, 8>}, {transform_indices = @transform_2, window_bounds = array<i64: 1, 8, 32>}, {transform_indices = @transform_3, window_bounds = array<i64: 32, 32>}, {transform_indices = @transform_4, window_bounds = array<i64: 1, 32>}, {transform_indices = @transform_5, window_bounds = array<i64: 32, 32>}, {transform_indices = @transform_6, window_bounds = array<i64: 1, 32>}, {transform_indices = @transform_7, window_bounds = array<i64: 1, 8, 32>}]} {
    %c0_i32 = arith.constant 0 : i32
    %0 = arith.cmpi eq, %arg2, %c0_i32 : i32
    %1 = arith.extui %0 : i1 to i32
    %c0_i32_0 = arith.constant 0 : i32
    %2 = arith.cmpi ne, %1, %c0_i32_0 : i32
    scf.if %2 {
      %cst_35 = arith.constant 0.000000e+00 : f32
      %171 = vector.broadcast %cst_35 : f32 to vector<32x32xf32>
      %c0_36 = arith.constant 0 : index
      %c0_37 = arith.constant 0 : index
      %172 = vector.load %arg12[%c0_36, %c0_37] : memref<32x32xf32, #tpu.memory_space<vmem>>, vector<32x32xf32>
      tpu.vector_store %arg12[%c0_36, %c0_37], %171 {strides = array<i32>} : memref<32x32xf32, #tpu.memory_space<vmem>>, vector<32x32xf32>,
    } else {
    }
    %c0 = arith.constant 0 : index
    %c0_1 = arith.constant 0 : index
    %c0_2 = arith.constant 0 : index
    %3 = vector.load %arg3[%c0, %c0_1, %c0_2] : memref<1x8x32xf32, #tpu.memory_space<vmem>>, vector<1x8x32xf32>
    %4 = vector.shape_cast %3 : vector<1x8x32xf32> to vector<8x32xf32>
    %c0_3 = arith.constant 0 : index
    %c0_4 = arith.constant 0 : index
    %5 = vector.load %arg6[%c0_3, %c0_4] : memref<32x32xf32, #tpu.memory_space<vmem>>, vector<32x32xf32>
    %cst = arith.constant dense<0.000000e+00> : vector<8x32xf32>
    %6 = tpu.matmul %4, %5, %cst {dimension_numbers = #tpu.dot_dimension_numbers<[1], [0], [0], [1], [0, 0, 1, 1], [], []>} : vector<8x32xf32>, vector<32x32xf32>, vector<8x32xf32> -> vector<8x32xf32>
    %c0_5 = arith.constant 0 : index
    %c0_6 = arith.constant 0 : index
    %7 = vector.load %arg7[%c0_5, %c0_6] : memref<1x32xf32, #tpu.memory_space<vmem>>, vector<1x32xf32>
    %8 = vector.broadcast %7 : vector<1x32xf32> to vector<8x32xf32>
    %9 = arith.addf %6, %8 : vector<8x32xf32>
    %cst_7 = arith.constant 2.000000e+01 : f32
    %10 = vector.broadcast %cst_7 : f32 to vector<8x32xf32>
    %11 = arith.cmpf ogt, %9, %10 : vector<8x32xf32>
    %cst_8 = arith.constant 2.000000e+01 : f32
    %12 = vector.broadcast %cst_8 : f32 to vector<8x32xf32>
    %13 = arith.minimumf %9, %12 : vector<8x32xf32>
    %14 = math.exp %13 : vector<8x32xf32>
    %15 = math.log1p %14 : vector<8x32xf32>
    %16 = arith.select %11, %9, %15 : vector<8x32xi1>, vector<8x32xf32>
    %c0_9 = arith.constant 0 : index
    %c0_10 = arith.constant 0 : index
    %17 = vector.load %arg11[%c0_9, %c0_10] : memref<8x32xf32, #tpu.memory_space<vmem>>, vector<8x32xf32>
    tpu.vector_store %arg11[%c0_9, %c0_10], %16 {strides = array<i32>} : memref<8x32xf32, #tpu.memory_space<vmem>>, vector<8x32xf32>,
    %c0_11 = arith.constant 0 : index
    %c0_12 = arith.constant 0 : index
    %18 = vector.load %arg8[%c0_11, %c0_12] : memref<32x32xf32, #tpu.memory_space<vmem>>, vector<32x32xf32>
    %c0_13 = arith.constant 0 : index
    %c0_14 = arith.constant 0 : index
    %19 = vector.load %arg9[%c0_13, %c0_14] : memref<1x32xf32, #tpu.memory_space<vmem>>, vector<1x32xf32>
    %c0_15 = arith.constant 0 : index
    %c0_16 = arith.constant 0 : index
    %20 = vector.load %arg12[%c0_15, %c0_16] : memref<32x32xf32, #tpu.memory_space<vmem>>, vector<32x32xf32>
    %c0_i32_17 = arith.constant 0 : i32
    %c8_i32 = arith.constant 8 : i32
    %21 = arith.muli %c0_i32_17, %c8_i32 : i32
    %22 = tpu.assume_multiple %21, 8 : i32
    %c64_i32 = arith.constant 64 : i32
    %23 = arith.muli %c0_i32_17, %c64_i32 : i32
    %24 = tpu.assume_multiple %23, 64 : i32
    %25 = arith.index_cast %22 : i32 to index
    %c0_18 = arith.constant 0 : index
    %26 = vector.load %arg11[%25, %c0_18] : memref<8x32xf32, #tpu.memory_space<vmem>>, vector<8x32xf32>
    %c0_19 = arith.constant 0 : index
    %27 = arith.index_cast %22 : i32 to index
    %c0_20 = arith.constant 0 : index
    %28 = vector.load %arg5[%c0_19, %27, %c0_20] : memref<1x8x32xf32, #tpu.memory_space<vmem>>, vector<1x8x32xf32>
    %29 = vector.shape_cast %28 : vector<1x8x32xf32> to vector<8x32xf32>
    %c0_21 = arith.constant 0 : index
    %30 = arith.index_cast %24 : i32 to index
    %c0_22 = arith.constant 0 : index
    %31 = vector.load %arg4[%c0_21, %30, %c0_22] : memref<1x64x8xf32, #tpu.memory_space<vmem>>, vector<1x64x8xf32>
    %32 = vector.shape_cast %31 : vector<1x64x8xf32> to vector<64x8xf32>
    %33 = arith.mulf %26, %29 : vector<8x32xf32>
    %34 = vector.extract_strided_slice %26 {offsets = [0, 0], sizes = [1, 32], strides = [1, 1]} : vector<8x32xf32> to vector<1x32xf32>
    %35 = vector.broadcast %34 : vector<1x32xf32> to vector<32x32xf32>
    %36 = arith.mulf %35, %18 : vector<32x32xf32>
    %37 = math.exp %36 : vector<32x32xf32>
    %38 = vector.extract_strided_slice %32 {offsets = [0, 0], sizes = [32, 1], strides = [1, 1]} : vector<64x8xf32> to vector<32x1xf32>
    %39 = vector.extract_strided_slice %33 {offsets = [0, 0], sizes = [1, 32], strides = [1, 1]} : vector<8x32xf32> to vector<1x32xf32>
    %40 = vector.broadcast %38 : vector<32x1xf32> to vector<32x32xf32>
    %41 = vector.broadcast %39 : vector<1x32xf32> to vector<32x32xf32>
    %42 = arith.mulf %40, %41 : vector<32x32xf32>
    %43 = arith.mulf %37, %20 : vector<32x32xf32>
    %44 = arith.addf %43, %42 : vector<32x32xf32>
    %45 = vector.extract_strided_slice %32 {offsets = [32, 0], sizes = [32, 1], strides = [1, 1]} : vector<64x8xf32> to vector<32x1xf32>
    %46 = vector.broadcast %45 : vector<32x1xf32> to vector<32x32xf32>
    %47 = arith.mulf %46, %44 : vector<32x32xf32>
    %cst_23 = arith.constant dense<0.000000e+00> : vector<32xf32>
    %48 = vector.multi_reduction <add>, %47, %cst_23 [0] : vector<32x32xf32> to vector<32xf32>
    %49 = vector.shape_cast %48 : vector<32xf32> to vector<1x32xf32>
    %50 = vector.extract_strided_slice %26 {offsets = [1, 0], sizes = [1, 32], strides = [1, 1]} : vector<8x32xf32> to vector<1x32xf32>
    %51 = vector.broadcast %50 : vector<1x32xf32> to vector<32x32xf32>
    %52 = arith.mulf %51, %18 : vector<32x32xf32>
    %53 = math.exp %52 : vector<32x32xf32>
    %54 = vector.extract_strided_slice %32 {offsets = [0, 1], sizes = [32, 1], strides = [1, 1]} : vector<64x8xf32> to vector<32x1xf32>
    %55 = vector.extract_strided_slice %33 {offsets = [1, 0], sizes = [1, 32], strides = [1, 1]} : vector<8x32xf32> to vector<1x32xf32>
    %56 = vector.broadcast %54 : vector<32x1xf32> to vector<32x32xf32>
    %57 = vector.broadcast %55 : vector<1x32xf32> to vector<32x32xf32>
    %58 = arith.mulf %56, %57 : vector<32x32xf32>
    %59 = arith.mulf %53, %44 : vector<32x32xf32>
    %60 = arith.addf %59, %58 : vector<32x32xf32>
    %61 = vector.extract_strided_slice %32 {offsets = [32, 1], sizes = [32, 1], strides = [1, 1]} : vector<64x8xf32> to vector<32x1xf32>
    %62 = vector.broadcast %61 : vector<32x1xf32> to vector<32x32xf32>
    %63 = arith.mulf %62, %60 : vector<32x32xf32>
    %cst_24 = arith.constant dense<0.000000e+00> : vector<32xf32>
    %64 = vector.multi_reduction <add>, %63, %cst_24 [0] : vector<32x32xf32> to vector<32xf32>
    %65 = vector.shape_cast %64 : vector<32xf32> to vector<1x32xf32>
    %66 = vector.extract_strided_slice %26 {offsets = [2, 0], sizes = [1, 32], strides = [1, 1]} : vector<8x32xf32> to vector<1x32xf32>
    %67 = vector.broadcast %66 : vector<1x32xf32> to vector<32x32xf32>
    %68 = arith.mulf %67, %18 : vector<32x32xf32>
    %69 = math.exp %68 : vector<32x32xf32>
    %70 = vector.extract_strided_slice %32 {offsets = [0, 2], sizes = [32, 1], strides = [1, 1]} : vector<64x8xf32> to vector<32x1xf32>
    %71 = vector.extract_strided_slice %33 {offsets = [2, 0], sizes = [1, 32], strides = [1, 1]} : vector<8x32xf32> to vector<1x32xf32>
    %72 = vector.broadcast %70 : vector<32x1xf32> to vector<32x32xf32>
    %73 = vector.broadcast %71 : vector<1x32xf32> to vector<32x32xf32>
    %74 = arith.mulf %72, %73 : vector<32x32xf32>
    %75 = arith.mulf %69, %60 : vector<32x32xf32>
    %76 = arith.addf %75, %74 : vector<32x32xf32>
    %77 = vector.extract_strided_slice %32 {offsets = [32, 2], sizes = [32, 1], strides = [1, 1]} : vector<64x8xf32> to vector<32x1xf32>
    %78 = vector.broadcast %77 : vector<32x1xf32> to vector<32x32xf32>
    %79 = arith.mulf %78, %76 : vector<32x32xf32>
    %cst_25 = arith.constant dense<0.000000e+00> : vector<32xf32>
    %80 = vector.multi_reduction <add>, %79, %cst_25 [0] : vector<32x32xf32> to vector<32xf32>
    %81 = vector.shape_cast %80 : vector<32xf32> to vector<1x32xf32>
    %82 = vector.extract_strided_slice %26 {offsets = [3, 0], sizes = [1, 32], strides = [1, 1]} : vector<8x32xf32> to vector<1x32xf32>
    %83 = vector.broadcast %82 : vector<1x32xf32> to vector<32x32xf32>
    %84 = arith.mulf %83, %18 : vector<32x32xf32>
    %85 = math.exp %84 : vector<32x32xf32>
    %86 = vector.extract_strided_slice %32 {offsets = [0, 3], sizes = [32, 1], strides = [1, 1]} : vector<64x8xf32> to vector<32x1xf32>
    %87 = vector.extract_strided_slice %33 {offsets = [3, 0], sizes = [1, 32], strides = [1, 1]} : vector<8x32xf32> to vector<1x32xf32>
    %88 = vector.broadcast %86 : vector<32x1xf32> to vector<32x32xf32>
    %89 = vector.broadcast %87 : vector<1x32xf32> to vector<32x32xf32>
    %90 = arith.mulf %88, %89 : vector<32x32xf32>
    %91 = arith.mulf %85, %76 : vector<32x32xf32>
    %92 = arith.addf %91, %90 : vector<32x32xf32>
    %93 = vector.extract_strided_slice %32 {offsets = [32, 3], sizes = [32, 1], strides = [1, 1]} : vector<64x8xf32> to vector<32x1xf32>
    %94 = vector.broadcast %93 : vector<32x1xf32> to vector<32x32xf32>
    %95 = arith.mulf %94, %92 : vector<32x32xf32>
    %cst_26 = arith.constant dense<0.000000e+00> : vector<32xf32>
    %96 = vector.multi_reduction <add>, %95, %cst_26 [0] : vector<32x32xf32> to vector<32xf32>
    %97 = vector.shape_cast %96 : vector<32xf32> to vector<1x32xf32>
    %98 = vector.extract_strided_slice %26 {offsets = [4, 0], sizes = [1, 32], strides = [1, 1]} : vector<8x32xf32> to vector<1x32xf32>
    %99 = vector.broadcast %98 : vector<1x32xf32> to vector<32x32xf32>
    %100 = arith.mulf %99, %18 : vector<32x32xf32>
    %101 = math.exp %100 : vector<32x32xf32>
    %102 = vector.extract_strided_slice %32 {offsets = [0, 4], sizes = [32, 1], strides = [1, 1]} : vector<64x8xf32> to vector<32x1xf32>
    %103 = vector.extract_strided_slice %33 {offsets = [4, 0], sizes = [1, 32], strides = [1, 1]} : vector<8x32xf32> to vector<1x32xf32>
    %104 = vector.broadcast %102 : vector<32x1xf32> to vector<32x32xf32>
    %105 = vector.broadcast %103 : vector<1x32xf32> to vector<32x32xf32>
    %106 = arith.mulf %104, %105 : vector<32x32xf32>
    %107 = arith.mulf %101, %92 : vector<32x32xf32>
    %108 = arith.addf %107, %106 : vector<32x32xf32>
    %109 = vector.extract_strided_slice %32 {offsets = [32, 4], sizes = [32, 1], strides = [1, 1]} : vector<64x8xf32> to vector<32x1xf32>
    %110 = vector.broadcast %109 : vector<32x1xf32> to vector<32x32xf32>
    %111 = arith.mulf %110, %108 : vector<32x32xf32>
    %cst_27 = arith.constant dense<0.000000e+00> : vector<32xf32>
    %112 = vector.multi_reduction <add>, %111, %cst_27 [0] : vector<32x32xf32> to vector<32xf32>
    %113 = vector.shape_cast %112 : vector<32xf32> to vector<1x32xf32>
    %114 = vector.extract_strided_slice %26 {offsets = [5, 0], sizes = [1, 32], strides = [1, 1]} : vector<8x32xf32> to vector<1x32xf32>
    %115 = vector.broadcast %114 : vector<1x32xf32> to vector<32x32xf32>
    %116 = arith.mulf %115, %18 : vector<32x32xf32>
    %117 = math.exp %116 : vector<32x32xf32>
    %118 = vector.extract_strided_slice %32 {offsets = [0, 5], sizes = [32, 1], strides = [1, 1]} : vector<64x8xf32> to vector<32x1xf32>
    %119 = vector.extract_strided_slice %33 {offsets = [5, 0], sizes = [1, 32], strides = [1, 1]} : vector<8x32xf32> to vector<1x32xf32>
    %120 = vector.broadcast %118 : vector<32x1xf32> to vector<32x32xf32>
    %121 = vector.broadcast %119 : vector<1x32xf32> to vector<32x32xf32>
    %122 = arith.mulf %120, %121 : vector<32x32xf32>
    %123 = arith.mulf %117, %108 : vector<32x32xf32>
    %124 = arith.addf %123, %122 : vector<32x32xf32>
    %125 = vector.extract_strided_slice %32 {offsets = [32, 5], sizes = [32, 1], strides = [1, 1]} : vector<64x8xf32> to vector<32x1xf32>
    %126 = vector.broadcast %125 : vector<32x1xf32> to vector<32x32xf32>
    %127 = arith.mulf %126, %124 : vector<32x32xf32>
    %cst_28 = arith.constant dense<0.000000e+00> : vector<32xf32>
    %128 = vector.multi_reduction <add>, %127, %cst_28 [0] : vector<32x32xf32> to vector<32xf32>
    %129 = vector.shape_cast %128 : vector<32xf32> to vector<1x32xf32>
    %130 = vector.extract_strided_slice %26 {offsets = [6, 0], sizes = [1, 32], strides = [1, 1]} : vector<8x32xf32> to vector<1x32xf32>
    %131 = vector.broadcast %130 : vector<1x32xf32> to vector<32x32xf32>
    %132 = arith.mulf %131, %18 : vector<32x32xf32>
    %133 = math.exp %132 : vector<32x32xf32>
    %134 = vector.extract_strided_slice %32 {offsets = [0, 6], sizes = [32, 1], strides = [1, 1]} : vector<64x8xf32> to vector<32x1xf32>
    %135 = vector.extract_strided_slice %33 {offsets = [6, 0], sizes = [1, 32], strides = [1, 1]} : vector<8x32xf32> to vector<1x32xf32>
    %136 = vector.broadcast %134 : vector<32x1xf32> to vector<32x32xf32>
    %137 = vector.broadcast %135 : vector<1x32xf32> to vector<32x32xf32>
    %138 = arith.mulf %136, %137 : vector<32x32xf32>
    %139 = arith.mulf %133, %124 : vector<32x32xf32>
    %140 = arith.addf %139, %138 : vector<32x32xf32>
    %141 = vector.extract_strided_slice %32 {offsets = [32, 6], sizes = [32, 1], strides = [1, 1]} : vector<64x8xf32> to vector<32x1xf32>
    %142 = vector.broadcast %141 : vector<32x1xf32> to vector<32x32xf32>
    %143 = arith.mulf %142, %140 : vector<32x32xf32>
    %cst_29 = arith.constant dense<0.000000e+00> : vector<32xf32>
    %144 = vector.multi_reduction <add>, %143, %cst_29 [0] : vector<32x32xf32> to vector<32xf32>
    %145 = vector.shape_cast %144 : vector<32xf32> to vector<1x32xf32>
    %146 = vector.extract_strided_slice %26 {offsets = [7, 0], sizes = [1, 32], strides = [1, 1]} : vector<8x32xf32> to vector<1x32xf32>
    %147 = vector.broadcast %146 : vector<1x32xf32> to vector<32x32xf32>
    %148 = arith.mulf %147, %18 : vector<32x32xf32>
    %149 = math.exp %148 : vector<32x32xf32>
    %150 = vector.extract_strided_slice %32 {offsets = [0, 7], sizes = [32, 1], strides = [1, 1]} : vector<64x8xf32> to vector<32x1xf32>
    %151 = vector.extract_strided_slice %33 {offsets = [7, 0], sizes = [1, 32], strides = [1, 1]} : vector<8x32xf32> to vector<1x32xf32>
    %152 = vector.broadcast %150 : vector<32x1xf32> to vector<32x32xf32>
    %153 = vector.broadcast %151 : vector<1x32xf32> to vector<32x32xf32>
    %154 = arith.mulf %152, %153 : vector<32x32xf32>
    %155 = arith.mulf %149, %140 : vector<32x32xf32>
    %156 = arith.addf %155, %154 : vector<32x32xf32>
    %157 = vector.extract_strided_slice %32 {offsets = [32, 7], sizes = [32, 1], strides = [1, 1]} : vector<64x8xf32> to vector<32x1xf32>
    %158 = vector.broadcast %157 : vector<32x1xf32> to vector<32x32xf32>
    %159 = arith.mulf %158, %156 : vector<32x32xf32>
    %cst_30 = arith.constant dense<0.000000e+00> : vector<32xf32>
    %160 = vector.multi_reduction <add>, %159, %cst_30 [0] : vector<32x32xf32> to vector<32xf32>
    %161 = vector.shape_cast %160 : vector<32xf32> to vector<1x32xf32>
    %162 = tpu.concatenate %49, %65, %81, %97, %113, %129, %145, %161 in 0 : vector<1x32xf32>, vector<1x32xf32>, vector<1x32xf32>, vector<1x32xf32>, vector<1x32xf32>, vector<1x32xf32>, vector<1x32xf32>, vector<1x32xf32> -> vector<8x32xf32>
    %163 = vector.broadcast %19 : vector<1x32xf32> to vector<8x32xf32>
    %164 = arith.mulf %163, %29 : vector<8x32xf32>
    %165 = arith.addf %162, %164 : vector<8x32xf32>
    %c0_31 = arith.constant 0 : index
    %166 = arith.index_cast %22 : i32 to index
    %c0_32 = arith.constant 0 : index
    %167 = vector.load %arg10[%c0_31, %166, %c0_32] : memref<1x8x32xf32, #tpu.memory_space<vmem>>, vector<1x8x32xf32>
    %168 = vector.shape_cast %167 : vector<1x8x32xf32> to vector<8x32xf32>
    %169 = vector.shape_cast %165 : vector<8x32xf32> to vector<1x8x32xf32>
    tpu.vector_store %arg10[%c0_31, %166, %c0_32], %169 {strides = array<i32>} : memref<1x8x32xf32, #tpu.memory_space<vmem>>, vector<1x8x32xf32>,
    %c1_i32 = arith.constant 1 : i32
    %c0_33 = arith.constant 0 : index
    %c0_34 = arith.constant 0 : index
    %170 = vector.load %arg12[%c0_33, %c0_34] : memref<32x32xf32, #tpu.memory_space<vmem>>, vector<32x32xf32>
    tpu.vector_store %arg12[%c0_33, %c0_34], %156 {strides = array<i32>} : memref<32x32xf32, #tpu.memory_space<vmem>>, vector<32x32xf32>,
    return
  }
  func.func @transform_0(%arg0: i32, %arg1: i32, %arg2: i32) -> (i32, i32, i32) {
    %c0_i32 = arith.constant 0 : i32
    %c0_i32_0 = arith.constant 0 : i32
    return %arg0, %arg2, %c0_i32 : i32, i32, i32
  }
  func.func @transform_1(%arg0: i32, %arg1: i32, %arg2: i32) -> (i32, i32, i32) {
    %c0_i32 = arith.constant 0 : i32
    %c0_i32_0 = arith.constant 0 : i32
    return %arg0, %arg2, %c0_i32 : i32, i32, i32
  }
  func.func @transform_2(%arg0: i32, %arg1: i32, %arg2: i32) -> (i32, i32, i32) {
    %c0_i32 = arith.constant 0 : i32
    return %arg0, %arg2, %arg1 : i32, i32, i32
  }
  func.func @transform_3(%arg0: i32, %arg1: i32, %arg2: i32) -> (i32, i32) {
    %c0_i32 = arith.constant 0 : i32
    %c0_i32_0 = arith.constant 0 : i32
    return %c0_i32, %arg1 : i32, i32
  }
  func.func @transform_4(%arg0: i32, %arg1: i32, %arg2: i32) -> (i32, i32) {
    %c0_i32 = arith.constant 0 : i32
    %c0_i32_0 = arith.constant 0 : i32
    return %c0_i32, %arg1 : i32, i32
  }
  func.func @transform_5(%arg0: i32, %arg1: i32, %arg2: i32) -> (i32, i32) {
    %c0_i32 = arith.constant 0 : i32
    %c0_i32_0 = arith.constant 0 : i32
    return %c0_i32, %arg1 : i32, i32
  }
  func.func @transform_6(%arg0: i32, %arg1: i32, %arg2: i32) -> (i32, i32) {
    %c0_i32 = arith.constant 0 : i32
    %c0_i32_0 = arith.constant 0 : i32
    return %c0_i32, %arg1 : i32, i32
  }
  func.func @transform_7(%arg0: i32, %arg1: i32, %arg2: i32) -> (i32, i32, i32) {
    %c0_i32 = arith.constant 0 : i32
    return %arg0, %arg2, %arg1 : i32, i32, i32
  }
}

</mosaic_0001>

<bundles_post_ra>
// kernel: ssm_forward.1
= control target key start
LH: loop header
LB: loop body
LE: loop exit
PB: predicated region body
PF: predicated region fallthrough
CT: control target
= control target key end

     0   :  { %12 = vsyncpa [#allocation5], 0  ;;  %s2526_s0 = inlined_call_operand.vmem [shape: f32[2,16,32], index: 0, kind: input, shape index: {}]   ;;  %s2527_s1 = inlined_call_operand.vmem [shape: f32[2,128,8], index: 1, kind: input, shape index: {}]   ;;  %s2528_s2 = inlined_call_operand.vmem [shape: f32[2,16,32], index: 2, kind: input, shape index: {}]   ;;  %s2529_s3 = inlined_call_operand.vmem [shape: f32[32,32], index: 3, kind: input, shape index: {}]   ;;  %s2530_s4 = inlined_call_operand.vmem [shape: f32[1,32], index: 4, kind: input, shape index: {}]   ;;  %s2531_s5 = inlined_call_operand.vmem [shape: f32[32,32], index: 5, kind: input, shape index: {}]   ;;  %s2532_s6 = inlined_call_operand.vmem [shape: f32[1,32], index: 6, kind: input, shape index: {}]   ;;  %s2533_s7 = inlined_call_operand.hbm [shape: f32[2,16,32], index: 7, kind: output, shape index: {}]  }
   0x1   :  { %14 = vsyncpa [#allocation5 + $0x1], 0  ;;  %s1818_s24 = smov 0   ;;  %s1820_s25 = smov 0  }
   0x2   :  { %s1822_s26 = smov 0   ;;  %s1824_s27 = smov 0  }
   0x3   :  { %s1826_s28 = smov 0   ;;  %s1828_s29 = smov 0  }
   0x4   :  { %s1830_s30 = smov 0   ;;  %s1832_s8 = smov 0  }
   0x5 LB: > { %2546 = sst [smem:[#allocation7_spill]] %s1736_s24  ;;  %s1456_s9 = sadd.s32 4294967295, %s1764_s8   ;;  %s1764_s8 = sphi %s1832_s8, %s20_s8   ;;  %s1760_s30 = sphi %s1830_s30, %s2600_s30   ;;  %s1756_s29 = sphi %s1828_s29, %s2599_s29   ;;  %s1752_s28 = sphi %s1826_s28, %s2603_s28   ;;  %s1748_s27 = sphi %s1824_s27, %s2597_s27   ;;  %s1744_s26 = sphi %s1822_s26, %s2596_s26   ;;  %s1740_s25 = sphi %s1820_s25, %s2602_s25   ;;  %s1736_s24 = sphi %s1818_s24, %s2601_s24  }
   0x6   : > { %2547 = sst [smem:[#allocation8_spill]] %s1744_s26  ;;  %s1457_s10 = sadd.s32 4294967294, %s1764_s8  }
   0x7   : > { %2548 = sst [smem:[#allocation9_spill]] %s1756_s29  ;;  %s32_s11 = sadd.s32 1, %s1756_s29 }
   0x8   : > { %2549 = sst [smem:[#allocation10_spill]] %s1760_s30  ;;  %p33_p0 = scmp.ge.s32.totalorder %s32_s11, 2 }
   0x9   : > { %2550 = sst [smem:[#allocation11_spill]] %s1764_s8  ;;  %s39_s12 = sadd.s32 1, %s1760_s30 }
   0xa   : > { %p250_p1 = scmp.ne.s32.totalorder %s1744_s26, %s1740_s25  ;;  %p251_p2 = scmp.eq.s32.totalorder %s1456_s9, 3 }
   0xb   : > { %s2605_s11 = smov (%p33_p0, %s32_s11), 0  ;;  %s2607_s12 = smov (!%p33_p0, %s39_s12), %s1760_s30 }
   0xc   : > { %2551 = sst [smem:[#allocation12_spill]] %s2605_s11  ;;  %s234_s13 = ssub.s32 %s1756_s29, %s2605_s11 }
   0xd   : > { %p1869_p3 = por %p251_p2, %p250_p1  ;;  %p41_p4 = scmp.ge.s32.totalorder %s2607_s12, 2 }
   0xe   : > { %p256_p5 = scmp.ne.s32.totalorder %s1740_s25, %s1736_s24  ;;  %p257_p6 = scmp.eq.s32.totalorder %s1457_s10, 3 }
   0xf   : > { %p1464_p7 = scmp.ge.s32.totalorder %s1764_s8, 1  ;;  %s2609_s12 = smov (%p41_p4, %s2607_s12), 0 }
  0x10   : > { %2553 = sst [smem:[#allocation13_spill]] %s2609_s12  ;;  %p1878_p8 = por %p257_p6, %p256_p5 }
  0x11   : > { %p339_p9 = scmp.lt.s32.totalorder %s1764_s8, 5  ;;  %s233_s16 = ssub.s32 %s1760_s30, %s2609_s12 }
  0x12   : > { %s2554_s15 = scalar_select %p1878_p8, 1, 0 }
  0x13   : > { %s240_s17 = sadd.s32 1, %s1744_s26  ;;  %s235_s18 = sor.u32 %s234_s13, %s233_s16 }
  0x14   : > { %2555 = sst [smem:[#allocation14_spill]] %s2554_s15  ;;  %p340_p10 = pnand %p1464_p7, %p339_p9 }
  0x15   : > { %p238_p11 = scmp.eq.s32.totalorder %s235_s18, 0 }
  0x16   : > { %343 = sbr.rel (%p340_p10) target bundleno = 418 (0x1a2), region = 48 }
  0x17   : > { %s1887_s19 = scalar_select %p238_p11, %s1744_s26, %s240_s17  }
  0x19   : > { %2556 = sst [smem:[#allocation15_spill]] %s1887_s19 }
  0x1b   : > { %s2538_s20 = sand.u32 1, %s1740_s25   ;;  %p408_p12 = scmp.lt.s32.totalorder %s1752_s28, 1 }
  0x1c   : > { %s1893_s21 = sshll.u32 %s2538_s20, 3  ;;  %p410_p13 = scmp.lt.s32.totalorder %s1748_s27, 1 }
  0x1d   : > { %s1468_s22 = sshll.u32 %s1748_s27, 3  ;;  %p1473_p1 = scmp.ne.s32.totalorder %s1748_s27, 0 }
  0x1e   : > { %s409_s23 = scalar_select %p408_p12, %s1752_s28, 1 }
  0x1f   : > { %s411_s9 = scalar_select %p410_p13, %s1748_s27, 1 }
  0x20   : > { %s1466_s10 = sshll.u32 %s409_s23, 1  ;;  %p419_p0 = scmp.lt.s32.totalorder %s1468_s22, 15 }
  0x21   : > { %s413_s13 = sadd.s32 %s1466_s10, %s411_s9  ;;  %s1469_s17 = sshll.u32 %s409_s23, 4 }
  0x22   : > { %s1467_s16 = sshll.u32 %s413_s13, 3  ;;  %s2611_s22 = smov (!%p419_p0, %s1468_s22), 15 }
  0x23   : > { %s1902_s11 = scalar_lea.vmem %s2526_s0, %s1467_s16  ;;  %s1907_s20 = scalar_lea.vmem %s2528_s2, %s1467_s16 }
  0x24   : > { %s422_s19 = sadd.s32 %s1469_s17, %s2611_s22  ;;  %s407_s9 = scalar_lea.vmem [#allocation4], %s1893_s21 }
  0x25   : > { %s1470_s26 = sshll.u32 %s422_s19, 3  ;;  %454 = sbr.rel (%p1473_p1) target bundleno = 45 (0x2d), region = 52 }
  0x26   : > { %s1912_s8 = scalar_lea.vmem %s2527_s1, %s1470_s26 }
  0x2a   : > { %vm455_vm0 = vcmask 261120   ;;  %v1766_v0 = vmov 0.0  }
  0x2b   : > { %456 = vst.msk [vmem:[#allocation3] sm:$0xff] %vm455_vm0, %v1766_v0  ;;  %457 = vst.msk [vmem:[#allocation3 + $0x8] sm:$0xff] %vm455_vm0, %v1766_v0 }
  0x2c   : > { %458 = vst.msk [vmem:[#allocation3 + $0x10] sm:$0xff] %vm455_vm0, %v1766_v0  ;;  %459 = vst.msk [vmem:[#allocation3 + $0x18] sm:$0xff] %vm455_vm0, %v1766_v0 }
  0x2d PF: > { %v1917_v1 = vld [vmem:[%s1912_s8 + $0x10] sm:$0xff]  ;;  %v464_v2 = vld [vmem:[%s2529_s3 + $0x18] sm:$0xff]  ;;  %v1767_v3 = vmov 0   ;;  %v1768_v4 = vmov 0.0   ;;  %v462_v7 = vld [vmem:[%s2529_s3 + $0x8] sm:$0xff]  ;;  %vm1769_vm1 = vmmov 0  }
  0x2e   : > { %1581 = vset.pattern.permute.xlu1 %v1767_v3  ;;  %1487 = vmatprep.subr.mxu0 %v1768_v4  ;;  %v463_v5 = vld [vmem:[%s2529_s3 + $0x10] sm:$0xff]  ;;  %v1927_v6 = vld [vmem:[%s1912_s8 + $0x18] sm:$0xff]  ;;  %v1933_v8 = vld [vmem:[%s1912_s8] sm:$0xff]  ;;  %vm472_vm2 = vcmask 261120   ;;  %v1770_v16 = vmov 1   ;;  %v1771_v17 = vmov 2  }
  0x2f   : > { %609 = vperm.xlu1 %1581, %v1917_v1   ;;  %1488 = vmatpush3.msra.mxu0 %v464_v2  ;;  %v461_v9 = vld [vmem:[%s2529_s3] sm:$0xff]  ;;  %v1942_v11 = vld [vmem:[%s1912_s8 + $0x28] sm:$0xff]  ;;  %v1951_v13 = vld [vmem:[%s1912_s8 + $0x38] sm:$0xff]  ;;  %v1772_v18 = vmov 3   ;;  %v1773_v19 = vmov 4   ;;  %v1774_v20 = vmov 5  }
  0x30   : > { %1489 = vmatprep.subr.mxu0 %v1768_v4  ;;  %1495 = vmatprep.mubr.msk.f32.mxu0 %vm1769_vm1, %v1768_v4  ;;  %v460_v10 = vld [vmem:[%s1902_s11] sm:$0xff]  ;;  %v1945_v12 = vld [vmem:[%s1912_s8 + $0x8] sm:$0xff]  ;;  %v1959_v15 = vld [vmem:[%s1912_s8 + $0x30] sm:$0xff]  ;;  %v1775_v21 = vmov 7   ;;  %v1776_v22 = vmov 6   ;;  %vm1237_vm5 = vcmask 1040384  }
  0x31   : > { %1490 = vmatpush3.msra.mxu0 %v463_v5  ;;  %1580 = vset.pattern.permute.xlu0 %v1767_v3  ;;  %v1954_v14 = vld [vmem:[%s1912_s8 + $0x20] sm:$0xff]  ;;  %vm1239_vm6 = vcmask 1041408   ;;  %vm1241_vm7 = vcmask 1042432   ;;  %vm1243_vm8 = vcmask 1043456   ;;  %vm1245_vm9 = vcmask 1044480   ;;  %s1478_s30 = sshll.u32 %s1752_s28, 1 }
  0x32   : > { %1491 = vmatprep.subr.mxu0 %v1768_v4  ;;  %599 = vperm.xlu0 %1580, %v1933_v8   ;;  %v1474_v41 = vld [vmem:[%s2530_s4] ss:$0 sm:$0xff]  ;;  %vm1247_vm10 = vcmask 1045504   ;;  %s1277_s12 = sadd.s32 %s1748_s27, %s1478_s30  ;;  %vm1249_vm11 = vcmask 1046528   ;;  %s1281_s19 = sshll.u32 %s407_s9, 4  ;;  %s1282_s19 = int_to_ptr.vmem [resolvable:$true] %s1281_s19 }
  0x33   : > { %614 = vperm.xlu1 %1581, %v1927_v6   ;;  %1492 = vmatpush3.msra.mxu0 %v462_v7  ;;  %s1479_s15 = sshll.u32 %s1277_s12, 7  ;;  %s2591_s11 = sand.u32 1, %s1740_s25  }
  0x34   : > { %1493 = vmatprep.subr.mxu0 %v1768_v4  ;;  %v581_v4 = vlaneseq  ;;  %s1279_s8 = scalar_lea.hbm %s2533_s7, %s1479_s15  ;;  %s1265_s27 = scalar_lea.sflag [#allocation5], %s2591_s11 }
  0x35   : > { %1494 = vmatpush3.msra.mxu0 %v461_v9  ;;  %s1672_s23 = scalar_lea.vmem %s1282_s19, 128  ;;  %s1777_s10 = smov [#allocation4]  }
  0x36   : > { %1496 = vmatmul.mubr.msk.f32.vlgmr.msra.gmra.mxu0 %vm472_vm2, %v460_v10  ;;  %604 = vperm.xlu0 %1580, %v1945_v12   ;;  %p1673_p2 = scmp.ne.s32.totalorder %s1282_s19, %s1672_s23  ;;  %s1676_s13 = sshll.u32 %s1777_s10, 4  ;;  %s1677_s13 = int_to_ptr.vmem [resolvable:$false] %s1676_s13 }
  0x37   : > { %640 = vperm.xlu1 %1581, %v1942_v11   ;;  %s1678_s16 = scalar_lea.vmem %s1677_s13, 256  ;;  %p1679_p6 = scmp.lt.s32.totalorder %s1282_s19, %s1677_s13 }
  0x38   : > { %p1674_p4 = pnand %p1673_p2, %p1869_p3  ;;  %p1680_p7 = scmp.lt.s32.totalorder %s1678_s16, %s1672_s23 }
  0x3a   : > { %635 = vperm.xlu0 %1580, %v1954_v14   ;;  %p1675_p5 = pneg %p1674_p4  ;;  %p1681_p9 = por %p1680_p7, %p1679_p6 }
  0x3b   : > { %650 = vperm.xlu1 %1581, %v1951_v13  }
  0x3c   : > { %p1682_p10 = pnand %p1681_p9, %p1675_p5 }
  0x3e   : > { %645 = vperm.xlu0 %1580, %v1959_v15  }
  0x3f   : > { %1583 = vset.pattern.permute.xlu1 %v1770_v16 }
  0x40   : > { %691 = vperm.xlu1 %1583, %v1945_v12  }
  0x42   : > { %1582 = vset.pattern.permute.xlu0 %v1770_v16 }
  0x43   : > { %687 = vperm.xlu0 %1582, %v1933_v8  }
  0x44   : > { %695 = vperm.xlu1 %1583, %v1917_v1  }
  0x47   : > { %699 = vperm.xlu0 %1582, %v1927_v6  }
  0x48   : > { %719 = vperm.xlu1 %1583, %v1954_v14  }
  0x4b   : > { %723 = vperm.xlu0 %1582, %v1942_v11  }
  0x4c   : > { %727 = vperm.xlu1 %1583, %v1959_v15  }
  0x4f   : > { %731 = vperm.xlu0 %1582, %v1951_v13  }
  0x50   : > { %1584 = vset.pattern.permute.xlu1 %v1771_v17 }
  0x51   : > { %768 = vperm.xlu1 %1584, %v1933_v8  }
  0x53   : > { %1585 = vset.pattern.permute.xlu0 %v1771_v17  ;;  %v2105_v17 = vld [vmem:[%s2531_s5] sm:$0xff] }
  0x54   : > { %772 = vperm.xlu0 %1585, %v1945_v12  }
  0x55   : > { %776 = vperm.xlu1 %1584, %v1917_v1  }
  0x58   : > { %800 = vperm.xlu0 %1585, %v1954_v14  }
  0x59   : > { %780 = vperm.xlu1 %1584, %v1927_v6  }
  0x5c   : > { %808 = vperm.xlu0 %1585, %v1959_v15  }
  0x5d   : > { %804 = vperm.xlu1 %1584, %v1942_v11  }
  0x60   : > { %1586 = vset.pattern.permute.xlu0 %v1772_v18 }
  0x61   : > { %812 = vperm.xlu1 %1584, %v1951_v13   ;;  %849 = vperm.xlu0 %1586, %v1933_v8  }
  0x65   : > { %1587 = vset.pattern.permute.xlu1 %v1772_v18  ;;  %861 = vperm.xlu0 %1586, %v1927_v6   ;;  %v2110_v18 = vld [vmem:[%s2531_s5 + $0x10] sm:$0xff] }
  0x66   : > { %853 = vperm.xlu1 %1587, %v1945_v12  }
  0x69   : > { %885 = vperm.xlu0 %1586, %v1942_v11  }
  0x6a   : > { %857 = vperm.xlu1 %1587, %v1917_v1  }
  0x6d   : > { %893 = vperm.xlu0 %1586, %v1951_v13  }
  0x6e   : > { %881 = vperm.xlu1 %1587, %v1954_v14  }
  0x71   : > { %1589 = vset.pattern.permute.xlu0 %v1773_v19 }
  0x72   : > { %889 = vperm.xlu1 %1587, %v1959_v15   ;;  %934 = vperm.xlu0 %1589, %v1945_v12  }
  0x76   : > { %1588 = vset.pattern.permute.xlu1 %v1773_v19  ;;  %962 = vperm.xlu0 %1589, %v1954_v14  }
  0x77   : > { %930 = vperm.xlu1 %1588, %v1933_v8  }
  0x7a   : > { %970 = vperm.xlu0 %1589, %v1959_v15  }
  0x7b   : > { %938 = vperm.xlu1 %1588, %v1917_v1  }
  0x7e   : > { %1591 = vset.pattern.permute.xlu0 %v1774_v20 }
  0x7f   : > { %942 = vperm.xlu1 %1588, %v1927_v6   ;;  %1015 = vperm.xlu0 %1591, %v1945_v12  }
  0x83   : > { %966 = vperm.xlu1 %1588, %v1942_v11   ;;  %1594 = vset.pattern.permute.xlu0 %v1775_v21 }
  0x84   : > { %1177 = vperm.xlu0 %1594, %v1945_v12  }
  0x87   : > { %1590 = vset.pattern.permute.xlu1 %v1774_v20 }
  0x88   : > { %1011 = vperm.xlu1 %1590, %v1933_v8   ;;  %1181 = vperm.xlu0 %1594, %v1917_v1  }
  0x8c   : > { %1019 = vperm.xlu1 %1590, %v1917_v1   ;;  %1205 = vperm.xlu0 %1594, %v1954_v14  }
  0x90   : > { %1023 = vperm.xlu1 %1590, %v1927_v6   ;;  %1599 = vset.pattern.permute.xlu0 %v1776_v22 }
  0x91   : > { %1092 = vperm.xlu0 %1599, %v1933_v8  }
  0x94   : > { %1592 = vset.pattern.permute.xlu1 %v1776_v22 }
  0x95   : > { %1096 = vperm.xlu1 %1592, %v1945_v12   ;;  %1104 = vperm.xlu0 %1599, %v1927_v6  }
  0x99   : > { %1100 = vperm.xlu1 %1592, %v1917_v1   ;;  %1128 = vperm.xlu0 %1599, %v1942_v11  }
  0x9d   : > { %1593 = vset.pattern.permute.xlu1 %v1775_v21  ;;  %1132 = vperm.xlu0 %1599, %v1959_v15  }
  0x9e   : > { %1173 = vperm.xlu1 %1593, %v1933_v8   ;;  %v2086_v8 = vshrl.u32 %v581_v4, 7 }
  0xa0   : > { %v672_v12 = vsub.s32 1, %v2086_v8 }
  0xa1   : > { %1136 = vperm.xlu0 %1599, %v1951_v13  }
  0xa2   : > { %1595 = vset.pattern.permute.xlu1 %v1774_v20 }
  0xa3   : > { %1043 = vperm.xlu1 %1595, %v1954_v14  }
  0xa5   : > { %1603 = vset.pattern.permute.xlu0 %v1775_v21 }
  0xa7   : > { %1047 = vperm.xlu1 %1595, %v1942_v11  }
  0xaa   : > { %v2010_v23 = vpop.permute.xlu1 %609 }
  0xab   : > { %1596 = vset.pattern.permute.xlu1 %v1776_v22 }
  0xac   : > { %1124 = vperm.xlu1 %1596, %v1954_v14   ;;  %v2096_v14 = vld [vmem:[%s1907_s20] sm:$0xff] }
  0xad   : > { %v2038_v33 = vpop.permute.xlu0 %599  ;;  %2561 = vst [vmem:[#allocation20_spill] sm:$0xff] %v2096_v14 }
  0xae   : > { %v2013_v24 = vpop.permute.xlu1 %614 }
  0xb0   : > { %1597 = vset.pattern.permute.xlu1 %v1774_v20 }
  0xb1   : > { %1051 = vperm.xlu1 %1597, %v1959_v15   ;;  %v2042_v35 = vpop.permute.xlu0 %604 }
  0xb2   : > { %v2016_v25 = vpop.permute.xlu1 %640 }
  0xb5   : > { %1598 = vset.pattern.permute.xlu1 %v1775_v21  ;;  %v2046_v37 = vpop.permute.xlu0 %635 }
  0xb6   : > { %1185 = vperm.xlu1 %1598, %v1927_v6   ;;  %v2019_v26 = vpop.permute.xlu1 %650 }
  0xb9   : > { %v2050_v39 = vpop.permute.xlu0 %645 }
  0xba   : > { %1209 = vperm.xlu1 %1598, %v1942_v11   ;;  %v583_v11 = vsub.s32 0, %v2086_v8 }
  0xbb   : > { %v2022_v27 = vpop.permute.xlu1 %691 }
  0xbe   : > { %1600 = vset.pattern.permute.xlu1 %v1773_v19  ;;  %v2057_v42 = vpop.permute.xlu0 %687  ;;  %v834_v19 = vsub.s32 3, %v2086_v8 }
  0xbf   : > { %974 = vperm.xlu1 %1600, %v1951_v13   ;;  %v2025_v28 = vpop.permute.xlu1 %695 }
  0xc2   : > { %v2061_v48 = vpop.permute.xlu0 %699 }
  0xc3   : > { %1601 = vset.pattern.permute.xlu1 %v1774_v20  ;;  %v2028_v29 = vpop.permute.xlu1 %719 }
  0xc4   : > { %1055 = vperm.xlu1 %1601, %v1951_v13  }
  0xc6   : > { %v2065_v51 = vpop.permute.xlu0 %723 }
  0xc7   : > { %v2032_v30 = vpop.permute.xlu1 %727 }
  0xc8   : > { %1602 = vset.pattern.permute.xlu1 %v1775_v21 }
  0xc9   : > { %1213 = vperm.xlu1 %1602, %v1959_v15  }
  0xca   : > { %v2069_v53 = vpop.permute.xlu0 %731 }
  0xcc   : > { %v2034_v31 = vpop.permute.xlu1 %768 }
  0xcd   : > { %1217 = vperm.xlu1 %1602, %v1951_v13   ;;  %v753_v13 = vsub.s32 2, %v2086_v8 }
  0xcf   : > { %v2073_v57 = vpop.permute.xlu0 %772 }
  0xd0   : > { %v2036_v32 = vpop.permute.xlu1 %776 }
  0xd3   : > { %v2077_v59 = vpop.permute.xlu0 %800 }
  0xd4   : > { %v2040_v34 = vpop.permute.xlu1 %780 }
  0xd7   : > { %v2081_v0 = vpop.permute.xlu0 %808 }
  0xd8   : > { %v2044_v36 = vpop.permute.xlu1 %804 }
  0xd9   : > { %2557 = vst [vmem:[#allocation16_spill] sm:$0xff] %v2044_v36 }
  0xdc   : > { %v2048_v38 = vpop.permute.xlu1 %812  ;;  %v2088_v9 = vpop.permute.xlu0 %849 }
  0xdd   : > { %2558 = vst [vmem:[#allocation17_spill] sm:$0xff] %v2048_v38 }
  0xe0   : > { %v2098_v15 = vpop.permute.xlu0 %861 }
  0xe1   : > { %v2052_v40 = vpop.permute.xlu1 %853 }
  0xe5   : > { %v2059_v44 = vpop.permute.xlu1 %857 }
  0xe9   : > { %v2063_v50 = vpop.permute.xlu1 %881 }
  0xed   : > { %v2067_v52 = vpop.permute.xlu1 %889 }
  0xee   : > { %2559 = vst [vmem:[#allocation18_spill] sm:$0xff] %v2067_v52 }
  0xf2   : > { %v2071_v54 = vpop.permute.xlu1 %930 }
  0xf6   : > { %v542_v43 = vpop.f32.mrf.mxu0  ;;  %v2075_v58 = vpop.permute.xlu1 %938 }
  0xf7   : > { %v543_v45 = vadd.f32 %v1474_v41, %v542_v43 }
  0xf8   : > { %v1497_v46 = vpop.f32.mrf.mxu0 }
  0xf9   : > { %v547_v47 = vmin.f32 %v543_v45, 20.0  ;;  %vm546_vm4 = vcmp.gt.f32.partialorder %v543_v45, 20.0 }
  0xfa   : > { %v2079_v61 = vpop.permute.xlu1 %942 }
  0xfb   : > { %v548_v49 = vmul.f32 1.442695, %v547_v47  ;;  %v915_v47 = vsub.s32 4, %v2086_v8 }
  0xfd   : > { %1604 = vpow2.f32 %v548_v49 }
  0xfe   : > { %v2083_v5 = vpop.permute.xlu1 %966 }
  0xff   : > { %2560 = vst [vmem:[#allocation19_spill] sm:$0xff] %v2083_v5 }
 0x103   : > { %v2090_v10 = vpop.permute.xlu1 %1011 }
 0x107   : > { %v2115_v22 = vpop.permute.xlu1 %1019 }
 0x108   : > { %2562 = vst [vmem:[#allocation21_spill] sm:$0xff] %v2115_v22 }
 0x10a   : > { %v1605_v55 = vpop.eup %1604 }
 0x10b   : > { %v550_v56 = vadd.f32 1.0, %v1605_v55  ;;  %v553_v60 = vmul.f32 -0.5, %v1605_v55  ;;  %v556_v63 = vand.u32 2147483647, %v1605_v55 }
 0x10d   : > { %1606 = vlog2.f32 %v550_v56  ;;  %v554_v62 = vadd.f32 1.0, %v553_v60  ;;  %vm557_vm3 = vcmp.lt.f32.partialorder %v556_v63, 0.0004427343  ;;  %v2132_v63 = vpop.permute.xlu0 %885 }
 0x10e   : > { %2563 = vst [vmem:[#allocation22_spill] sm:$0xff] %v2132_v63 }
 0x10f   : > { %v555_v3 = vmul.f32 %v1605_v55, %v554_v62 }
 0x111   : > { %v2176_v63 = vpop.permute.xlu0 %893 }
 0x112   : > { %2566 = vst [vmem:[#allocation24_spill] sm:$0xff] %v2176_v63 }
 0x11a   : > { %v1607_v1 = vpop.eup %1606 }
 0x11b   : > { %v552_v2 = vmul.f32 0.6931472, %v1607_v1 }
 0x11d   : > { %v558_v6 = vsel %vm557_vm3, %v555_v3, %v552_v2 }
 0x11e   : > { %v559_v7 = vsel %vm546_vm4, %v543_v45, %v558_v6 }
 0x11f   : > { %560 = vst.msk [vmem:[#allocation2] sm:$0xff] %vm472_vm2, %v559_v7  ;;  %v2144_v7 = vld [vmem:[%s2531_s5 + $0x18] sm:$0xff] }
 0x126   : > { %v2100_v16 = vld [vmem:[#allocation2] sm:$0xff] }
 0x127   : > { %v584_v20 = vrot.slane %v2100_v16, %v583_v11  ;;  %v673_v21 = vrot.slane %v2100_v16, %v672_v12  ;;  %v2118_v41 = vrot.slane %v2100_v16, %v753_v13  ;;  %v2122_v43 = vmul.f32 %v2096_v14, %v2100_v16 }
 0x128   : > { %v2130_v62 = vrot.slane %v2100_v16, %v834_v19  ;;  %v2150_v1 = vrot.slane %v2100_v16, %v915_v47 }
 0x129   : > { %v585_v45 = vmul.f32 %v584_v20, %v2105_v17  ;;  %v587_v46 = vmul.f32 %v584_v20, %v2110_v18  ;;  %v674_v49 = vmul.f32 %v673_v21, %v2105_v17  ;;  %v676_v55 = vmul.f32 %v673_v21, %v2110_v18 }
 0x12a   : > { %v755_v2 = vmul.f32 %v2118_v41, %v2105_v17  ;;  %v2139_v4 = vrot.slane %v2122_v43, %v915_v47  ;;  %v757_v3 = vmul.f32 %v2118_v41, %v2110_v18  ;;  %v836_v22 = vmul.f32 %v2130_v62, %v2105_v17 }
 0x12b   : > { %v589_v56 = vmul.f32 1.442695, %v585_v45  ;;  %v593_v60 = vmul.f32 1.442695, %v587_v46  ;;  %v678_v6 = vmul.f32 1.442695, %v674_v49  ;;  %v2146_v45 = vpop.permute.xlu1 %1023  ;;  %v2156_v49 = vrot.slane %v2122_v43, %v672_v12 }
 0x12c   : > { %2564 = vst [vmem:[#allocation23_spill] sm:$0xff] %v2146_v45  ;;  %v682_v14 = vmul.f32 1.442695, %v676_v55  ;;  %v2565_v45 = vsub.s32 5, %v2086_v8  ;;  %v759_v47 = vmul.f32 1.442695, %v755_v2  ;;  %v838_v55 = vmul.f32 %v2130_v62, %v2110_v18 }
 0x12d   : > { %1608 = vpow2.f32 %v589_v56  ;;  %v620_v56 = vrot.slane %v2122_v43, %v583_v11  ;;  %v588_v11 = vmul.f32 %v584_v20, %v2144_v7  ;;  %v2173_v12 = vmul.f32 %v2139_v4, %v2071_v54  ;;  %v2189_v54 = vld [vmem:[%s2531_s5 + $0x8] sm:$0xff] }
 0x12e   : > { %1610 = vpow2.f32 %v593_v60  ;;  %v2163_v46 = vrot.slane %v2100_v16, %v2565_v45  ;;  %v2166_v60 = vrot.slane %v2122_v43, %v753_v13  ;;  %v677_v5 = vmul.f32 %v673_v21, %v2144_v7 }
 0x12f   : > { %1612 = vpow2.f32 %v678_v6  ;;  %v2567_v45 = vsub.s32 6, %v2086_v8  ;;  %v763_v13 = vmul.f32 1.442695, %v757_v3  ;;  %v2184_v36 = vrot.slane %v2122_v43, %v834_v19  ;;  %v2198_v3 = vpop.permute.xlu1 %1096 }
 0x130   : > { %1614 = vpow2.f32 %v682_v14  ;;  %v595_v38 = vmul.f32 1.442695, %v588_v11  ;;  %v621_v6 = vmul.f32 %v620_v56, %v2038_v33  ;;  %v2194_v63 = vmul.f32 %v2156_v49, %v2057_v42  ;;  %2569 = vst [vmem:[#allocation26_spill] sm:$0xff] %v2198_v3  ;;  %v935_v3 = vpop.permute.xlu0 %934 }
 0x131   : > { %v2181_v2 = vrot.slane %v2100_v16, %v2567_v45  ;;  %v840_v52 = vmul.f32 1.442695, %v836_v22  ;;  %v758_v14 = vmul.f32 %v2118_v41, %v2144_v7  ;;  %1616 = vpow2.f32 %v759_v47 }
 0x132   : > { %v2202_v19 = vmul.f32 %v2166_v60, %v2034_v31  ;;  %v844_v11 = vmul.f32 1.442695, %v838_v55  ;;  %v2206_v45 = vmul.f32 %v2139_v4, %v2075_v58  ;;  %1618 = vpow2.f32 %v595_v38 }
 0x133   : > { %2568 = vst [vmem:[#allocation25_spill] sm:$0xff] %v2181_v2  ;;  %v684_v33 = vmul.f32 1.442695, %v677_v5  ;;  %v839_v42 = vmul.f32 %v2130_v62, %v2144_v7  ;;  %v586_v22 = vmul.f32 %v584_v20, %v2189_v54  ;;  %1620 = vpow2.f32 %v763_v13  ;;  %v566_v2 = vld [vmem:[#allocation3] sm:$0xff] }
 0x134   : > { %2570 = vst [vmem:[#allocation27_spill] sm:$0xff] %v2206_v45  ;;  %v2213_v47 = vmul.f32 %v2184_v36, %v2088_v9  ;;  %v920_v31 = vmul.f32 %v2150_v1, %v2144_v7  ;;  %v675_v55 = vmul.f32 %v673_v21, %v2189_v54  ;;  %1622 = vpow2.f32 %v840_v52 }
 0x135   : > { %v2219_v58 = vmul.f32 %v620_v56, %v2013_v24  ;;  %v765_v38 = vmul.f32 1.442695, %v758_v14  ;;  %v591_v5 = vmul.f32 1.442695, %v586_v22  ;;  %1624 = vpow2.f32 %v844_v11  ;;  %v568_v14 = vld [vmem:[#allocation3 + $0x10] sm:$0xff] }
 0x136   : > { %v2223_v20 = vmul.f32 %v2156_v49, %v2061_v48  ;;  %v2227_v9 = vmul.f32 %v2166_v60, %v2040_v34  ;;  %v2231_v21 = vmul.f32 %v2184_v36, %v2098_v15  ;;  %1626 = vpow2.f32 %v684_v33  ;;  %v2240_v48 = vpop.permute.xlu1 %1100 }
 0x137   : > { %v846_v24 = vmul.f32 1.442695, %v839_v42  ;;  %v2235_v52 = vmul.f32 %v2139_v4, %v2079_v61  ;;  %v2238_v13 = vmul.f32 %v620_v56, %v2042_v35  ;;  %2572 = vst [vmem:[#allocation29_spill] sm:$0xff] %v2240_v48  ;;  %v927_v22 = vmul.f32 1.442695, %v920_v31 }
 0x138   : > { %1628 = vpow2.f32 %v591_v5  ;;  %v680_v34 = vmul.f32 1.442695, %v675_v55  ;;  %v756_v15 = vmul.f32 %v2118_v41, %v2189_v54  ;;  %v2246_v61 = vmul.f32 %v2156_v49, %v2022_v27 }
 0x139   : > { %2571 = vst [vmem:[#allocation28_spill] sm:$0xff] %v2235_v52  ;;  %1630 = vpow2.f32 %v765_v38  ;;  %v837_v35 = vmul.f32 %v2130_v62, %v2189_v54  ;;  %v2252_v42 = vmul.f32 %v2166_v60, %v2073_v57  ;;  %v623_v31 = vmul.f32 %v620_v56, %v2010_v23  ;;  %v2263_v62 = vpop.permute.xlu0 %962 }
 0x13a   : > { %v1609_v11 = vpop.eup %1608  ;;  %v917_v41 = vmul.f32 %v2150_v1, %v2105_v17  ;;  %1632 = vpow2.f32 %v846_v24  ;;  %v918_v27 = vmul.f32 %v2150_v1, %v2189_v54  ;;  %v761_v57 = vmul.f32 1.442695, %v756_v15  ;;  %v2267_v24 = vpop.permute.xlu1 %1173 }
 0x13b   : > { %v1611_v45 = vpop.eup %1610  ;;  %v625_v33 = vmul.f32 %v1609_v11, %v566_v2  ;;  %v2259_v2 = vmul.f32 %v2184_v36, %v2052_v40  ;;  %1634 = vpow2.f32 %v680_v34  ;;  %v569_v40 = vld [vmem:[#allocation3 + $0x18] sm:$0xff]  ;;  %v789_v48 = vmul.f32 %v2166_v60, %v2036_v32 }
 0x13c   : > { %v627_v55 = vmul.f32 %v1611_v45, %v568_v14  ;;  %v1613_v38 = vpop.eup %1612  ;;  %v921_v23 = vmul.f32 1.442695, %v917_v41  ;;  %1636 = vpow2.f32 %v927_v22  ;;  %v842_v14 = vmul.f32 1.442695, %v837_v35 }
 0x13d   : > { %v629_v5 = vadd.f32 %v625_v33, %v621_v6  ;;  %v1615_v56 = vpop.eup %1614  ;;  %v708_v6 = vmul.f32 %v2156_v49, %v2025_v28  ;;  %v2573_v52 = vsub.s32 5, %v2086_v8  ;;  %v923_v35 = vmul.f32 1.442695, %v918_v27  ;;  %v2287_v27 = vpop.permute.xlu0 %970 }
 0x13e   : > { %v631_v11 = vadd.f32 %v627_v55, %v623_v31  ;;  %1638 = vpow2.f32 %v921_v23  ;;  %v1617_v15 = vpop.eup %1616  ;;  %v1001_v28 = vmul.f32 %v2163_v46, %v2144_v7  ;;  %v919_v49 = vmul.f32 %v2150_v1, %v2110_v18 }
 0x13f   : > { %v710_v45 = vmul.f32 %v1613_v38, %v629_v5  ;;  %v2274_v34 = vrot.slane %v2122_v43, %v2573_v52  ;;  %v1619_v31 = vpop.eup %1618  ;;  %v653_v55 = vmul.f32 %v2046_v37, %v629_v5  ;;  %1640 = vpow2.f32 %v761_v57  ;;  %v567_v57 = vld [vmem:[#allocation3 + $0x8] sm:$0xff] }
 0x140   : > { %v712_v33 = vmul.f32 %v1615_v56, %v631_v11  ;;  %v870_v60 = vmul.f32 %v2184_v36, %v2059_v44  ;;  %v1621_v52 = vpop.eup %1620  ;;  %v628_v38 = vmul.f32 %v1619_v31, %v569_v40  ;;  %v925_v23 = vmul.f32 1.442695, %v919_v49 }
 0x141   : > { %v714_v22 = vadd.f32 %v710_v45, %v2194_v63  ;;  %v2285_v63 = vmul.f32 %v2139_v4, %v935_v3  ;;  %v1623_v56 = vpop.eup %1622  ;;  %1642 = vpow2.f32 %v842_v14  ;;  %v655_v1 = vmul.f32 %v2050_v39, %v631_v11  ;;  %v2296_v3 = vpop.permute.xlu1 %1043 }
 0x142   : > { %v716_v32 = vadd.f32 %v712_v33, %v708_v6  ;;  %v2292_v37 = vmul.f32 %v2274_v34, %v2090_v10  ;;  %v1625_v5 = vpop.eup %1624  ;;  %v632_v44 = vadd.f32 %v628_v38, %v2219_v58  ;;  %1644 = vpow2.f32 %v923_v35 }
 0x143   : > { %v791_v41 = vmul.f32 %v1617_v15, %v714_v22  ;;  %v1008_v4 = vmul.f32 1.442695, %v1001_v28  ;;  %v1627_v6 = vpop.eup %1626  ;;  %v657_v14 = vsel %vm472_vm2, %v653_v55, 0.0  ;;  %v734_v39 = vmul.f32 %v2028_v29, %v714_v22  ;;  %v1016_v22 = vpop.permute.xlu0 %1015 }
 0x144   : > { %v793_v45 = vmul.f32 %v1621_v52, %v716_v32  ;;  %1646 = vpow2.f32 %v925_v23  ;;  %v713_v15 = vmul.f32 %v1627_v6, %v632_v44  ;;  %v656_v35 = vmul.f32 %v2019_v26, %v632_v44 }
 0x145   : > { %v795_v36 = vadd.f32 %v791_v41, %v2202_v19  ;;  %v1629_v40 = vpop.eup %1628  ;;  %v736_v19 = vmul.f32 %v2032_v30, %v716_v32  ;;  %v660_v49 = vsel %vm472_vm2, %v655_v1, 0.0  ;;  %v2574_v31 = vsub.s32 6, %v2086_v8 }
 0x146   : > { %v797_v11 = vadd.f32 %v793_v45, %v789_v48  ;;  %v1631_v58 = vpop.eup %1630  ;;  %v626_v28 = vmul.f32 %v1629_v40, %v567_v57  ;;  %v717_v29 = vadd.f32 %v713_v15, %v2223_v20  ;;  %1648 = vpow2.f32 %v1008_v4  ;;  %v2324_v45 = vpop.permute.xlu1 %1047 }
 0x147   : > { %v815_v10 = vmul.f32 %v2077_v59, %v795_v36  ;;  %v872_v33 = vmul.f32 %v1623_v56, %v795_v36  ;;  %v2307_v55 = vrot.slane %v2122_v43, %v2574_v31  ;;  %v1633_v52 = vpop.eup %1632  ;;  %v738_v30 = vsel %vm472_vm2, %v734_v39, 0.0 }
 0x148   : > { %v817_v48 = vmul.f32 %v2081_v0, %v797_v11  ;;  %v874_v59 = vmul.f32 %v1625_v5, %v797_v11  ;;  %v630_v32 = vadd.f32 %v626_v28, %v2238_v13  ;;  %v2315_v41 = vmul.f32 %v2274_v34, %v1016_v22  ;;  %v1635_v38 = vpop.eup %1634  ;;  %v2576_v22 = vld [vmem:[#allocation18_spill] sm:$0xff] }
 0x149   : > { %v876_v26 = vadd.f32 %v872_v33, %v2213_v47  ;;  %v819_v23 = vsel %vm472_vm2, %v815_v10, 0.0  ;;  %v794_v56 = vmul.f32 %v1631_v58, %v717_v29  ;;  %v741_v20 = vsel %vm472_vm2, %v736_v19, 0.0  ;;  %v1637_v5 = vpop.eup %1636 }
 0x14a   : > { %v2575_v0 = vsub.s32 7, %v2086_v8  ;;  %v662_v47 = vsel %vm472_vm2, %v656_v35, 0.0  ;;  %v654_v13 = vmul.f32 %v2016_v25, %v630_v32  ;;  %v711_v36 = vmul.f32 %v1635_v38, %v630_v32 }
 0x14b   : > { %v998_v44 = vmul.f32 %v2163_v46, %v2105_v17  ;;  %v1639_v57 = vpop.eup %1638  ;;  %v798_v4 = vadd.f32 %v794_v56, %v2227_v9  ;;  %v822_v6 = vsel %vm472_vm2, %v817_v48, 0.0  ;;  %v878_v39 = vadd.f32 %v874_v59, %v870_v60  ;;  %v2578_v56 = vld [vmem:[#allocation16_spill] sm:$0xff] }
 0x14c   : > { %v2322_v1 = vrot.slane %v2100_v16, %v2575_v0  ;;  %v999_v16 = vmul.f32 %v2163_v46, %v2189_v54  ;;  %v896_v11 = vmul.f32 %v2063_v50, %v876_v26  ;;  %v658_v40 = vsel %vm472_vm2, %v654_v13, 0.0  ;;  %v1641_v33 = vpop.eup %1640 }
 0x14d   : > { %v715_v10 = vadd.f32 %v711_v36, %v2246_v61  ;;  %v953_v25 = vmul.f32 %v1639_v57, %v876_v26  ;;  %v737_v15 = vmul.f32 %v2069_v53, %v717_v29  ;;  %v875_v19 = vmul.f32 %v1633_v52, %v798_v4  ;;  %v2344_v26 = vpop.permute.xlu1 %1124  ;;  %v2577_v29 = vld [vmem:[#allocation17_spill] sm:$0xff] }
 0x14e   : > { %v659_v58 = vadd.f32 %v658_v40, %v657_v14  ;;  %v1002_v35 = vmul.f32 1.442695, %v998_v44  ;;  %v1004_v31 = vmul.f32 1.442695, %v999_v16  ;;  %v1643_v48 = vpop.eup %1642  ;;  %v898_v61 = vmul.f32 %v2576_v22, %v878_v39  ;;  %v2355_v40 = vpop.permute.xlu0 %1177 }
 0x14f   : > { %v735_v9 = vmul.f32 %v2065_v51, %v715_v10  ;;  %v792_v28 = vmul.f32 %v1641_v33, %v715_v10  ;;  %v2340_v60 = vadd.f32 %v953_v25, %v2173_v12  ;;  %v879_v50 = vadd.f32 %v875_v19, %v2231_v21  ;;  %v1645_v53 = vpop.eup %1644  ;;  %v2579_v25 = vld [vmem:[#allocation27_spill] sm:$0xff] }
 0x150   : > { %v661_v59 = vadd.f32 %v660_v49, %v659_v58  ;;  %1650 = vpow2.f32 %v1002_v35  ;;  %v818_v14 = vmul.f32 %v2577_v29, %v798_v4  ;;  %v743_v32 = vsel %vm472_vm2, %v737_v15, 0.0  ;;  %v2580_v15 = vld [vmem:[#allocation24_spill] sm:$0xff]  ;;  %v2581_v58 = vld [vmem:[#allocation22_spill] sm:$0xff] }
 0x151   : > { %v739_v52 = vsel %vm472_vm2, %v735_v9, 0.0  ;;  %v796_v51 = vadd.f32 %v792_v28, %v2252_v42  ;;  %1652 = vpow2.f32 %v1004_v31  ;;  %v1647_v12 = vpop.eup %1646  ;;  %v900_v21 = vsel %vm472_vm2, %v896_v11, 0.0  ;;  %v2366_v19 = vpop.permute.xlu1 %1051  ;;  %v2582_v31 = vld [vmem:[#allocation25_spill] sm:$0xff] }
 0x152   : > { %v740_v38 = vadd.f32 %v739_v52, %v738_v30  ;;  %v663_v49 = vadd.f32 %v662_v47, %v661_v59  ;;  %v977_v36 = vmul.f32 %v2263_v62, %v2340_v60  ;;  %v955_v44 = vmul.f32 %v1647_v12, %v878_v39  ;;  %v2583_v59 = vld [vmem:[#allocation28_spill] sm:$0xff] }
 0x153   : > { %v816_v0 = vmul.f32 %v2578_v56, %v796_v51  ;;  %v873_v13 = vmul.f32 %v1643_v48, %v796_v51  ;;  %v956_v57 = vmul.f32 %v1637_v5, %v879_v50  ;;  %v903_v42 = vsel %vm472_vm2, %v898_v61, 0.0  ;;  %v2357_v10 = vpop.eup %1648  ;;  %v2584_v56 = vld [vmem:[#allocation19_spill] sm:$0xff] }
 0x154   : > { %v664_v4 = vrot.slane %v663_v49, 4  ;;  %v742_v16 = vadd.f32 %v741_v20, %v740_v38  ;;  %v824_v30 = vsel %vm472_vm2, %v818_v14, 0.0  ;;  %v2363_v33 = vadd.f32 %v955_v44, %v2579_v25  ;;  %v2379_v38 = vpop.permute.xlu0 %1181 }
 0x155   : > { %v820_v47 = vsel %vm472_vm2, %v816_v0, 0.0  ;;  %v877_v11 = vadd.f32 %v873_v13, %v2259_v2  ;;  %v899_v20 = vmul.f32 %v2580_v15, %v879_v50  ;;  %v981_v28 = vsel %vm472_vm2, %v977_v36, 0.0 }
 0x156   : > { %v821_v62 = vadd.f32 %v820_v47, %v819_v23  ;;  %v665_v39 = vadd.f32 %v664_v4, %v663_v49  ;;  %v744_v5 = vadd.f32 %v743_v32, %v742_v16  ;;  %v1079_v48 = vmul.f32 %v2582_v31, %v2105_v17 }
 0x157   : > { %v897_v35 = vmul.f32 %v2581_v58, %v877_v11  ;;  %v954_v9 = vmul.f32 %v1645_v53, %v877_v11  ;;  %v2373_v2 = vadd.f32 %v956_v57, %v2583_v59  ;;  %v979_v14 = vmul.f32 %v2287_v27, %v2363_v33  ;;  %v2385_v27 = vpop.permute.xlu1 %1185 }
 0x158   : > { %v666_v22 = vrot.slane %v665_v39, 2  ;;  %v745_v61 = vrot.slane %v744_v5, 4  ;;  %v823_v23 = vadd.f32 %v822_v6, %v821_v62  ;;  %v1083_v53 = vmul.f32 1.442695, %v1079_v48 }
 0x159   : > { %v901_v29 = vsel %vm472_vm2, %v897_v35, 0.0  ;;  %v958_v50 = vadd.f32 %v954_v9, %v2285_v63  ;;  %v905_v49 = vsel %vm472_vm2, %v899_v20, 0.0  ;;  %v1160_v6 = vmul.f32 %v2322_v1, %v2105_v17  ;;  %v2392_v35 = vpop.permute.xlu0 %1205 }
 0x15a   : > { %v902_v52 = vadd.f32 %v901_v29, %v900_v21  ;;  %v667_v51 = vadd.f32 %v666_v22, %v665_v39  ;;  %v746_v12 = vadd.f32 %v745_v61, %v744_v5  ;;  %v825_v32 = vadd.f32 %v824_v30, %v823_v23 }
 0x15b   : > { %v978_v0 = vmul.f32 %v2584_v56, %v958_v50  ;;  %1654 = vpow2.f32 %v1083_v53  ;;  %v984_v4 = vsel %vm472_vm2, %v979_v14, 0.0  ;;  %v1164_v16 = vmul.f32 1.442695, %v1160_v6  ;;  %v2394_v48 = vpop.permute.xlu1 %1209 }
 0x15c   : > { %v668_v13 = vrot.slane %v667_v51, 1  ;;  %v747_v63 = vrot.slane %v746_v12, 2  ;;  %v826_v36 = vrot.slane %v825_v32, 4  ;;  %v904_v44 = vadd.f32 %v903_v42, %v902_v52 }
 0x15d   : > { %v1651_v21 = vpop.eup %1650  ;;  %v982_v57 = vsel %vm472_vm2, %v978_v0, 0.0  ;;  %v1000_v30 = vmul.f32 %v2163_v46, %v2110_v18  ;;  %1656 = vpow2.f32 %v1164_v16  ;;  %v1161_v53 = vmul.f32 %v2322_v1, %v2189_v54  ;;  %v1093_v6 = vpop.permute.xlu0 %1092 }
 0x15e   : > { %v1653_v47 = vpop.eup %1652  ;;  %v669_v11 = vadd.f32 %v668_v13, %v667_v51  ;;  %v748_v25 = vadd.f32 %v747_v63, %v746_v12  ;;  %v827_v17 = vadd.f32 %v826_v36, %v825_v32  ;;  %v906_v62 = vadd.f32 %v905_v49, %v904_v44 }
 0x15f   : > { %v983_v39 = vadd.f32 %v982_v57, %v981_v28  ;;  %v1034_v42 = vmul.f32 %v1651_v21, %v2340_v60  ;;  %v1035_v5 = vmul.f32 %v1653_v47, %v958_v50  ;;  %v1006_v9 = vmul.f32 1.442695, %v1000_v30  ;;  %v975_v12 = vpop.permute.xlu1 %974 }
 0x160   : > { %v749_v15 = vrot.slane %v748_v25, 1  ;;  %v828_v20 = vrot.slane %v827_v17, 2  ;;  %v907_v58 = vrot.slane %v906_v62, 4  ;;  %v1080_v60 = vmul.f32 %v2582_v31, %v2189_v54 }
 0x161   : > { %v985_v46 = vadd.f32 %v984_v4, %v983_v39  ;;  %v1038_v59 = vadd.f32 %v1034_v42, %v2292_v37  ;;  %v2398_v22 = vadd.f32 %v1035_v5, %v2315_v41  ;;  %1658 = vpow2.f32 %v1006_v9 }
 0x162   : > { %v750_v28 = vadd.f32 %v749_v15, %v748_v25  ;;  %v829_v61 = vadd.f32 %v828_v20, %v827_v17  ;;  %v908_v23 = vadd.f32 %v907_v58, %v906_v62  ;;  %v1085_v14 = vmul.f32 1.442695, %v1080_v60  ;;  %v2587_v60 = vld [vmem:[#allocation21_spill] sm:$0xff] }
 0x163   : > { %v1058_v29 = vmul.f32 %v2296_v3, %v1038_v59  ;;  %v1059_v50 = vmul.f32 %v2324_v45, %v2398_v22  ;;  %v1081_v51 = vmul.f32 %v2582_v31, %v2110_v18  ;;  %v1166_v3 = vmul.f32 1.442695, %v1161_v53 }
 0x164   : > { %v830_v37 = vrot.slane %v829_v61, 1  ;;  %v909_v52 = vrot.slane %v908_v23, 2  ;;  %v1238_v41 = vsel %vm1237_vm5, %v669_v11, %v750_v28  ;;  %1660 = vpow2.f32 %v1085_v14 }
 0x165   : > { %v1062_v32 = vsel %vm472_vm2, %v1058_v29, 0.0  ;;  %v1063_v49 = vsel %vm472_vm2, %v1059_v50, 0.0  ;;  %v1087_v54 = vmul.f32 1.442695, %v1081_v51  ;;  %v2585_v13 = vsub.s32 7, %v2086_v8  ;;  %v1056_v50 = vpop.permute.xlu1 %1055 }
 0x166   : > { %v831_v56 = vadd.f32 %v830_v37, %v829_v61  ;;  %v910_v45 = vadd.f32 %v909_v52, %v908_v23  ;;  %v2412_v0 = vadd.f32 %v1063_v49, %v1062_v32  ;;  %v1111_v36 = vmul.f32 %v2307_v55, %v1093_v6  ;;  %v2588_v52 = vld [vmem:[#allocation26_spill] sm:$0xff]  ;;  %v2589_v49 = vld [vmem:[#allocation29_spill] sm:$0xff] }
 0x167   : > { %v2417_v63 = vrot.slane %v2122_v43, %v2585_v13  ;;  %v1082_v44 = vmul.f32 %v2582_v31, %v2144_v7  ;;  %v980_v21 = vmul.f32 %v975_v12, %v2373_v2  ;;  %1662 = vpow2.f32 %v1087_v54 }
 0x168   : > { %v1655_v57 = vpop.eup %1654  ;;  %v911_v4 = vrot.slane %v910_v45, 1  ;;  %v1240_v16 = vsel %vm1239_vm6, %v1238_v41, %v831_v56  ;;  %v1162_v30 = vmul.f32 %v2322_v1, %v2110_v18  ;;  %1664 = vpow2.f32 %v1166_v3  ;;  %v1105_v18 = vpop.permute.xlu0 %1104 }
 0x169   : > { %v1115_v47 = vmul.f32 %v1655_v57, %v1038_v59  ;;  %v1089_v8 = vmul.f32 1.442695, %v1082_v44  ;;  %v986_v43 = vsel %vm472_vm2, %v980_v21, 0.0  ;;  %v1163_v31 = vmul.f32 %v2322_v1, %v2144_v7 }
 0x16a   : > { %v912_v11 = vadd.f32 %v911_v4, %v910_v45  ;;  %v987_v25 = vadd.f32 %v986_v43, %v985_v46  ;;  %v1168_v17 = vmul.f32 1.442695, %v1162_v30  ;;  %v1037_v62 = vmul.f32 %v2357_v10, %v2373_v2  ;;  %v1657_v42 = vpop.eup %1656  ;;  %v2586_v46 = vld [vmem:[#allocation23_spill] sm:$0xff] }
 0x16b   : > { %v1119_v39 = vadd.f32 %v1115_v47, %v1111_v36  ;;  %1666 = vpow2.f32 %v1089_v8  ;;  %v1170_v20 = vmul.f32 1.442695, %v1163_v31  ;;  %v1192_v58 = vmul.f32 %v2417_v63, %v2267_v24  ;;  %v1214_v31 = vpop.permute.xlu1 %1213 }
 0x16c   : > { %v1242_v5 = vsel %vm1241_vm7, %v1240_v16, %v912_v11  ;;  %v988_v15 = vrot.slane %v987_v25, 4  ;;  %1668 = vpow2.f32 %v1168_v17  ;;  %v1033_v59 = vmul.f32 %v2274_v34, %v2586_v46  ;;  %v1129_v23 = vpop.permute.xlu0 %1128 }
 0x16d   : > { %v1196_v9 = vmul.f32 %v1657_v42, %v1119_v39  ;;  %v1032_v10 = vmul.f32 %v2274_v34, %v2587_v60  ;;  %1670 = vpow2.f32 %v1170_v20  ;;  %v1139_v14 = vmul.f32 %v2344_v26, %v1119_v39 }
 0x16e   : > { %v989_v7 = vadd.f32 %v988_v15, %v987_v25  ;;  %v1659_v1 = vpop.eup %1658  ;;  %v1041_v28 = vadd.f32 %v1037_v62, %v1033_v59  ;;  %v1112_v41 = vmul.f32 %v2307_v55, %v2588_v52  ;;  %v1113_v3 = vmul.f32 %v2307_v55, %v2589_v49 }
 0x16f   : > { %v1200_v2 = vadd.f32 %v1196_v9, %v1192_v58  ;;  %v1036_v61 = vmul.f32 %v1659_v1, %v2363_v33  ;;  %v1193_v56 = vmul.f32 %v2417_v63, %v2355_v40  ;;  %v1143_v6 = vsel %vm472_vm2, %v1139_v14, 0.0 }
 0x170   : > { %v990_v29 = vrot.slane %v989_v7, 2  ;;  %v1061_v33 = vmul.f32 %v1056_v50, %v1041_v28  ;;  %v1133_v13 = vpop.permute.xlu0 %1132  ;;  %v1114_v16 = vmul.f32 %v2307_v55, %v1105_v18  ;;  %v1195_v1 = vmul.f32 %v2417_v63, %v2385_v27 }
 0x171   : > { %1260 = vst.msk [vmem:[#allocation3] sm:$0xff] %vm472_vm2, %v1200_v2  ;;  %v1661_v24 = vpop.eup %1660  ;;  %v1040_v53 = vadd.f32 %v1036_v61, %v1032_v10  ;;  %v1220_v57 = vmul.f32 %v2392_v35, %v1200_v2  ;;  %v1218_v61 = vpop.permute.xlu1 %1217 }
 0x172   : > { %v991_v37 = vadd.f32 %v990_v29, %v989_v7  ;;  %v1116_v34 = vmul.f32 %v1661_v24, %v2398_v22  ;;  %v1067_v30 = vsel %vm472_vm2, %v1061_v33, 0.0 }
 0x173   : > { %v1060_v51 = vmul.f32 %v2366_v19, %v1040_v53  ;;  %v1224_v55 = vsel %vm472_vm2, %v1220_v57, 0.0 }
 0x174   : > { %v992_v12 = vrot.slane %v991_v37, 1  ;;  %v1663_v32 = vpop.eup %1662  ;;  %v1120_v45 = vadd.f32 %v1116_v34, %v1112_v41  ;;  %v1137_v20 = vpop.permute.xlu0 %1136 }
 0x175   : > { %v1665_v26 = vpop.eup %1664  ;;  %v1065_v54 = vsel %vm472_vm2, %v1060_v51, 0.0  ;;  %v1117_v22 = vmul.f32 %v1663_v32, %v1040_v53 }
 0x176   : > { %v993_v36 = vadd.f32 %v992_v12, %v991_v37  ;;  %v1066_v19 = vadd.f32 %v1065_v54, %v2412_v0  ;;  %v1140_v44 = vmul.f32 %v1129_v23, %v1120_v45  ;;  %v1197_v21 = vmul.f32 %v1665_v26, %v1120_v45 }
 0x177   : > { %v1121_v40 = vadd.f32 %v1117_v22, %v1113_v3  ;;  %v1194_v0 = vmul.f32 %v2417_v63, %v2379_v38  ;;  %v2590_v22 = vld [vmem:[#allocation20_spill] sm:$0xff] }
 0x178   : > { %v1667_v4 = vpop.eup %1666  ;;  %v1244_v47 = vsel %vm1243_vm8, %v1242_v5, %v993_v36  ;;  %v1144_v43 = vsel %vm472_vm2, %v1140_v44, 0.0  ;;  %v1201_v11 = vadd.f32 %v1197_v21, %v1193_v56  ;;  %v1068_v17 = vadd.f32 %v1067_v30, %v1066_v19 }
 0x179   : > { %v1669_v8 = vpop.eup %1668  ;;  %v1118_v25 = vmul.f32 %v1667_v4, %v1041_v28  ;;  %v1145_v62 = vadd.f32 %v1144_v43, %v1143_v6  ;;  %v1141_v39 = vmul.f32 %v1133_v13, %v1121_v40  ;;  %v1476_v6 = vld [vmem:[%s2532_s6] ss:$0 sm:$0xff] }
 0x17a   : > { %v1198_v35 = vmul.f32 %v1669_v8, %v1121_v40  ;;  %v1221_v42 = vmul.f32 %v2394_v48, %v1201_v11  ;;  %1261 = vst.msk [vmem:[#allocation3 + $0x8] sm:$0xff] %vm472_vm2, %v1201_v11  ;;  %v1069_v18 = vrot.slane %v1068_v17, 4  ;;  %v1671_v9 = vpop.eup %1670  ;;  %v1257_v36 = vmul.f32 %v1476_v6, %v2590_v22 }
 0x17b   : > { %v1122_v5 = vadd.f32 %v1118_v25, %v1114_v16  ;;  %v1146_v15 = vsel %vm472_vm2, %v1141_v39, 0.0 }
 0x17c   : > { %v1202_v58 = vadd.f32 %v1198_v35, %v1194_v0  ;;  %v1225_v46 = vsel %vm472_vm2, %v1221_v42, 0.0  ;;  %v1147_v59 = vadd.f32 %v1146_v15, %v1145_v62  ;;  %v1070_v7 = vadd.f32 %v1069_v18, %v1068_v17 }
 0x17d   : > { %v1142_v38 = vmul.f32 %v1137_v20, %v1122_v5  ;;  %v1226_v48 = vadd.f32 %v1225_v46, %v1224_v55  ;;  %v1199_v10 = vmul.f32 %v1671_v9, %v1122_v5 }
 0x17e   : > { %v1222_v60 = vmul.f32 %v1214_v31, %v1202_v58  ;;  %1262 = vst.msk [vmem:[#allocation3 + $0x10] sm:$0xff] %vm472_vm2, %v1202_v58  ;;  %v1071_v28 = vrot.slane %v1070_v7, 2 }
 0x17f   : > { %v1148_v2 = vsel %vm472_vm2, %v1142_v38, 0.0  ;;  %v1203_v50 = vadd.f32 %v1199_v10, %v1195_v1 }
 0x180   : > { %v1149_v23 = vadd.f32 %v1148_v2, %v1147_v59  ;;  %v1227_v29 = vsel %vm472_vm2, %v1222_v60, 0.0  ;;  %v1072_v24 = vadd.f32 %v1071_v28, %v1070_v7 }
 0x181   : > { %v1228_v14 = vadd.f32 %v1227_v29, %v1226_v48  ;;  %v1223_v37 = vmul.f32 %v1218_v61, %v1203_v50  ;;  %1263 = vst.msk [vmem:[#allocation3 + $0x18] sm:$0xff] %vm472_vm2, %v1203_v50 }
 0x182   : > { %v1150_v53 = vrot.slane %v1149_v23, 4  ;;  %v1073_v27 = vrot.slane %v1072_v24, 1 }
 0x183   : > { %v1229_v52 = vsel %vm472_vm2, %v1223_v37, 0.0 }
 0x184   : > { %v1151_v63 = vadd.f32 %v1150_v53, %v1149_v23  ;;  %v1074_v41 = vadd.f32 %v1073_v27, %v1072_v24  ;;  %v1230_v34 = vadd.f32 %v1229_v52, %v1228_v14 }
 0x186   : > { %v1152_v51 = vrot.slane %v1151_v63, 2  ;;  %v1231_v12 = vrot.slane %v1230_v34, 4  ;;  %v1246_v33 = vsel %vm1245_vm9, %v1244_v47, %v1074_v41 }
 0x188   : > { %v1153_v32 = vadd.f32 %v1152_v51, %v1151_v63  ;;  %v1232_v49 = vadd.f32 %v1231_v12, %v1230_v34 }
 0x18a   : > { %v1154_v3 = vrot.slane %v1153_v32, 1  ;;  %v1233_v56 = vrot.slane %v1232_v49, 2 }
 0x18c   : > { %v1155_v45 = vadd.f32 %v1154_v3, %v1153_v32  ;;  %v1234_v26 = vadd.f32 %v1233_v56, %v1232_v49 }
 0x18e   : > { %v1248_v54 = vsel %vm1247_vm10, %v1246_v33, %v1155_v45  ;;  %v1235_v13 = vrot.slane %v1234_v26, 1 }
 0x190   : > { %v1236_v19 = vadd.f32 %v1235_v13, %v1234_v26 }
 0x192   : > { %v1250_v44 = vsel %vm1249_vm11, %v1248_v54, %v1236_v19 }
 0x193   : > { %v1258_v21 = vadd.f32 %v1257_v36, %v1250_v44 }
 0x195   : > { %1259 = vst.msk [vmem:[%s407_s9] sm:$0xff] %vm472_vm2, %v1258_v21 }
 0x196   : > { %1685 = shalt.err (!%p1682_p10)
}
 0x197   : > { %s1686_s20 = scalar_lea.hbm %s1279_s8, 128  ;;  %s1690_s17 = scalar_lea.hbm %s2533_s7, 512 }
 0x198   : > { %p1687_p11 = scmp.ne.s32.totalorder %s1279_s8, %s1686_s20  ;;  %p1691_p0 = scmp.lt.s32.totalorder %s1279_s8, %s2533_s7 }
 0x199   : > { %p1692_p1 = scmp.lt.s32.totalorder %s1690_s17, %s1686_s20 }
 0x19a   : > { %p1688_p12 = pnand %p1687_p11, %p1869_p3 }
 0x19b   : > { %p1693_p2 = por %p1692_p1, %p1691_p0 }
 0x19c   : > { %p1689_p13 = pneg %p1688_p12 }
 0x19e   : > { %p1694_p4 = pnand %p1693_p2, %p1689_p13 }
 0x1a0   : > { %1697 = shalt.err (!%p1694_p4)
}
 0x1a1   : > { %1498 = dma.vmem_to_hbm [thread:$0]  (%p1869_p3), %s1282_s19, 128, %s1279_s8, %s1265_s27  }
 0x1a2 PF: > { %s2592_s30 = sld [smem:[#allocation11_spill]] }
 0x1a3   : > { %s2593_s24 = sld [smem:[#allocation7_spill]] }
 0x1a8   : > { %p1504_p5 = scmp.ge.s32.totalorder %s2592_s30, 2 }
 0x1a9   : > { %s1293_s12 = sand.u32 1, %s2593_s24  }
 0x1aa   : > { %p1501_p6 = pnand %p1504_p5, %p1878_p8  ;;  %s1294_s15 = scalar_lea.sflag [#allocation5], %s1293_s12 }
 0x1ac   : > { %p1502_p7 = pneg %p1501_p6 }
 0x1ae   : > { %1731 = dma.done.wait (%p1502_p7), %s1294_s15, 128  }
 0x1af   : > { %1733 = vsyncadd (%p1502_p7), %s1294_s15, 4294967168  ;;  %s20_s8 = sadd.s32 1, %s2592_s30   ;;  %s2595_s28 = sld [smem:[#allocation8_spill]] }
 0x1b0   : > { %p17_p9 = scmp.ge.s32.totalorder %s20_s8, 6   ;;  %s2596_s26 = sld [smem:[#allocation15_spill]] }
 0x1b1   : > { %s2597_s27 = sld [smem:[#allocation9_spill]]  ;;  %s2601_s24 = smov %s1740_s25 }
 0x1b2   : > { %s2598_s14 = sld [smem:[#allocation10_spill]] }
 0x1b3   : > { %s2599_s29 = sld [smem:[#allocation12_spill]] }
 0x1b4   : > { %s2600_s30 = sld [smem:[#allocation13_spill]]  ;;  %19 = sbr.rel (!%p17_p9) target bundleno = 5 (0x5), region = 105 }
 0x1b5   : > { %s2602_s25 = smov %s2595_s28 }
 0x1b8   : > { %s2603_s28 = smov %s2598_s14 }
 0x1b9   :  { %1299 = vsyncpa [#allocation5], 1 }
 0x1ba   :  { %1301 = vsyncpa [#allocation5 + $0x1], 1 }

</bundles_post_ra>
